<compile_context>
chip_gen: v5e
topology: v5e:2x2
jax: 0.10.0
libtpu: 0.0.40
codegen_flags: <defaults>
</compile_context>

<pallas_src>
import math
import functools

import jax
import jax.numpy as jnp
from jax.experimental import pallas as pl
from jax.experimental.pallas import tpu as pltpu


# ------------------------------ Model config ----------------------------------

VOCAB_SIZE = 100
TYPE_VOCAB_SIZE = 2
MAX_POSITIONS = 16
HIDDEN = 32
NUM_HEADS = 2
HEAD_DIM = HIDDEN // NUM_HEADS
NUM_LAYERS = 2
INTERMEDIATE = 64
PROJECTION_DIM = 16
POOLING_INDEX = 0
LN_EPS = 1e-12


# ----------------------------- Fused Pallas kernel ----------------------------

def _encoder_kernel(
    emb_ref, mask_ref,
    emb_g_ref, emb_b_ref,
    wqkv_ref, bqkv_ref, wo_ref, bo_ref,
    ln1_g_ref, ln1_b_ref,
    w1_ref, b1_ref, w2_ref, b2_ref,
    ln2_g_ref, ln2_b_ref,
    proj_w_ref, proj_b_ref,
    out_ref,
    attn_ref,                      # VMEM scratch, (B*S, H): attention context assembly
    *, B, S, nH, Dh, eps, pooling_index):
    H = nH * Dh

    def layernorm(x, g, b):
        mu = jnp.mean(x, axis=-1, keepdims=True)
        var = jnp.mean(jnp.square(x - mu), axis=-1, keepdims=True)
        return (x - mu) * jax.lax.rsqrt(var + eps) * g + b

    # Embedding LayerNorm (residual-free path — no zeros tensor needed).
    h = layernorm(emb_ref[...], emb_g_ref[...], emb_b_ref[...])            # (B*S, H)

    # Additive attention bias from the padding mask, computed in-kernel
    # (no jnp.repeat / per-head HBM duplicate).
    bias = (1.0 - mask_ref[...]) * -1e9                                    # (B, S)

    num_layers = wqkv_ref.shape[0]
    for l in range(num_layers):
        # ---- fused QKV projection; 1/sqrt(Dh) is already folded into the Q weights ----
        qkv = jnp.dot(h, wqkv_ref[l],
                      preferred_element_type=jnp.float32) + bqkv_ref[l]    # (B*S, 3H)

        # ---- attention: per-(batch, head) 2-D tiles, all VMEM-resident static slices ----
        for b in range(B):
            rows = slice(b * S, (b + 1) * S)
            bias_b = bias[b:b + 1, :]                                      # (1, S)
            for hh in range(nH):
                q = qkv[rows, hh * Dh:(hh + 1) * Dh]                       # (S, Dh)
                k = qkv[rows, H + hh * Dh:H + (hh + 1) * Dh]               # (S, Dh)
                v = qkv[rows, 2 * H + hh * Dh:2 * H + (hh + 1) * Dh]       # (S, Dh)
                # q @ k^T without forming an explicit transpose of k.
                s = jax.lax.dot_general(q, k, (((1,), (1,)), ((), ())),
                                        preferred_element_type=jnp.float32)  # (S, S)
                s = s + bias_b
                s = s - jnp.max(s, axis=-1, keepdims=True)
                p = jnp.exp(s)
                p = p * pl.reciprocal(jnp.sum(p, axis=-1, keepdims=True), approx=True)
                ctx = jnp.dot(p, v, preferred_element_type=jnp.float32)    # (S, Dh)
                attn_ref[rows, hh * Dh:(hh + 1) * Dh] = ctx

        # ---- attention output projection + residual + LayerNorm ----
        attn = jnp.dot(attn_ref[...], wo_ref[l],
                       preferred_element_type=jnp.float32) + bo_ref[l]
        h = layernorm(attn + h, ln1_g_ref[l], ln1_b_ref[l])

        # ---- FFN + residual + LayerNorm ----
        f = jnp.dot(h, w1_ref[l], preferred_element_type=jnp.float32) + b1_ref[l]
        # TODO(synk): PyTorch nn.GELU defaults to the exact erf form; tanh approximation is
        # used here (difference ~1e-3) to stay on well-supported Mosaic transcendentals.
        f = jax.nn.gelu(f, approximate=True)
        f = jnp.dot(f, w2_ref[l], preferred_element_type=jnp.float32) + b2_ref[l]
        h = layernorm(f + h, ln2_g_ref[l], ln2_b_ref[l])

    # ---- pooling at pooling_index, then projection ----
    for b in range(B):
        row = b * S + pooling_index
        pooled = h[row:row + 1, :]                                         # (1, H)
        out_ref[b:b + 1, :] = (jnp.dot(pooled, proj_w_ref[...],
                                       preferred_element_type=jnp.float32)
                               + proj_b_ref[...])


def _full_spec(arr):
    nd = arr.ndim
    return pl.BlockSpec(arr.shape, lambda i, _nd=nd: (0,) * _nd)


# ------------------------------ Parameters -------------------------------------

def init_params(key):
    def normal(key, shape, scale=0.02):
        return (scale * jax.random.normal(key, shape)).astype(jnp.float32)

    keys = iter(jax.random.split(key, 8 + NUM_LAYERS * 16))
    p = {
        "word_emb": normal(next(keys), (VOCAB_SIZE, HIDDEN)),
        "pos_emb": normal(next(keys), (MAX_POSITIONS, HIDDEN)),
        "type_emb": normal(next(keys), (TYPE_VOCAB_SIZE, HIDDEN)),
        "emb_ln_g": jnp.ones((HIDDEN,), jnp.float32),
        "emb_ln_b": jnp.zeros((HIDDEN,), jnp.float32),
        "proj_w": normal(next(keys), (HIDDEN, PROJECTION_DIM)),
        "proj_b": jnp.zeros((PROJECTION_DIM,), jnp.float32),
        "layers": [],
    }
    for _ in range(NUM_LAYERS):
        layer = {
            "wq": normal(next(keys), (HIDDEN, HIDDEN)), "bq": jnp.zeros((HIDDEN,), jnp.float32),
            "wk": normal(next(keys), (HIDDEN, HIDDEN)), "bk": jnp.zeros((HIDDEN,), jnp.float32),
            "wv": normal(next(keys), (HIDDEN, HIDDEN)), "bv": jnp.zeros((HIDDEN,), jnp.float32),
            "wo": normal(next(keys), (HIDDEN, HIDDEN)), "bo": jnp.zeros((HIDDEN,), jnp.float32),
            "ln1_g": jnp.ones((HIDDEN,), jnp.float32), "ln1_b": jnp.zeros((HIDDEN,), jnp.float32),
            "w1": normal(next(keys), (HIDDEN, INTERMEDIATE)), "b1": jnp.zeros((INTERMEDIATE,), jnp.float32),
            "w2": normal(next(keys), (INTERMEDIATE, HIDDEN)), "b2": jnp.zeros((HIDDEN,), jnp.float32),
            "ln2_g": jnp.ones((HIDDEN,), jnp.float32), "ln2_b": jnp.zeros((HIDDEN,), jnp.float32),
        }
        p["layers"].append(layer)
    return p


def pack_params(params):
    """Stack per-layer weights with a leading layer axis; merge QKV; fold in 1/sqrt(Dh)."""
    scale = 1.0 / math.sqrt(HEAD_DIM)
    layers = params["layers"]
    return {
        "word_emb": params["word_emb"],
        "pos_emb": params["pos_emb"],
        "type_emb": params["type_emb"],
        "emb_ln_g": params["emb_ln_g"].reshape(1, HIDDEN),
        "emb_ln_b": params["emb_ln_b"].reshape(1, HIDDEN),
        "wqkv": jnp.stack([jnp.concatenate([l["wq"] * scale, l["wk"], l["wv"]], axis=1)
                           for l in layers]),                               # (L, H, 3H)
        "bqkv": jnp.stack([jnp.concatenate([l["bq"] * scale, l["bk"], l["bv"]]).reshape(1, 3 * HIDDEN)
                           for l in layers]),                               # (L, 1, 3H)
        "wo": jnp.stack([l["wo"] for l in layers]),                         # (L, H, H)
        "bo": jnp.stack([l["bo"].reshape(1, HIDDEN) for l in layers]),      # (L, 1, H)
        "ln1_g": jnp.stack([l["ln1_g"].reshape(1, HIDDEN) for l in layers]),
        "ln1_b": jnp.stack([l["ln1_b"].reshape(1, HIDDEN) for l in layers]),
        "w1": jnp.stack([l["w1"] for l in layers]),                         # (L, H, I)
        "b1": jnp.stack([l["b1"].reshape(1, INTERMEDIATE) for l in layers]),
        "w2": jnp.stack([l["w2"] for l in layers]),                         # (L, I, H)
        "b2": jnp.stack([l["b2"].reshape(1, HIDDEN) for l in layers]),
        "ln2_g": jnp.stack([l["ln2_g"].reshape(1, HIDDEN) for l in layers]),
        "ln2_b": jnp.stack([l["ln2_b"].reshape(1, HIDDEN) for l in layers]),
        "proj_w": params["proj_w"],                                         # (H, P)
        "proj_b": params["proj_b"].reshape(1, PROJECTION_DIM),              # (1, P)
    }


# ------------------------------ Forward pass -----------------------------------

@jax.jit
def encoder_forward(packed, input_ids, attention_mask, token_type_ids):
    """Mirrors EncoderModel.forward: encoder -> [:, pooling_index, :] -> projection."""
    B, S = input_ids.shape

    # Embedding gathers are plain-JAX glue feeding the fused kernel.
    emb = (packed["word_emb"][input_ids]
           + packed["pos_emb"][jnp.arange(S)][None, :, :]
           + packed["type_emb"][token_type_ids]).reshape(B * S, HIDDEN).astype(jnp.float32)
    mask = attention_mask.astype(jnp.float32)                               # (B, S)

    args = (emb, mask,
            packed["emb_ln_g"], packed["emb_ln_b"],
            packed["wqkv"], packed["bqkv"], packed["wo"], packed["bo"],
            packed["ln1_g"], packed["ln1_b"],
            packed["w1"], packed["b1"], packed["w2"], packed["b2"],
            packed["ln2_g"], packed["ln2_b"],
            packed["proj_w"], packed["proj_b"])

    kernel = functools.partial(_encoder_kernel, B=B, S=S, nH=NUM_HEADS, Dh=HEAD_DIM,
                               eps=LN_EPS, pooling_index=POOLING_INDEX)

    return pl.pallas_call(
        kernel,
        out_shape=jax.ShapeDtypeStruct((B, PROJECTION_DIM), jnp.float32),
        grid=(1,),
        in_specs=[_full_spec(a) for a in args],
        out_specs=pl.BlockSpec((B, PROJECTION_DIM), lambda i: (0, 0)),
        scratch_shapes=[pltpu.VMEM((B * S, HIDDEN), jnp.float32)],
        compiler_params=pltpu.CompilerParams(dimension_semantics=("arbitrary",)),
    )(*args)


# --------------------------------- Main ----------------------------------------

if __name__ == "__main__":
    key = jax.random.PRNGKey(0)
    k_params, k_ids, k_types = jax.random.split(key, 3)

    B, S = 2, 8
    params = init_params(k_params)
    packed = pack_params(params)

    input_ids = jax.random.randint(k_ids, (B, S), 0, VOCAB_SIZE, dtype=jnp.int32)
    attention_mask = jnp.array([[1, 1, 1, 1, 1, 1, 0, 0],
                                [1, 1, 1, 1, 1, 1, 1, 1]], dtype=jnp.int32)
    token_type_ids = jax.random.randint(k_types, (B, S), 0, TYPE_VOCAB_SIZE, dtype=jnp.int32)

    out = encoder_forward(packed, input_ids, attention_mask, token_type_ids)
    out = jax.block_until_ready(out)

    assert out.shape == (B, PROJECTION_DIM), out.shape
    assert bool(jnp.all(jnp.isfinite(out)))
    print("KERNEL_OK")
</pallas_src>

<mosaic_0001>
module attributes {stable_mosaic.version = 11 : i64} {
  func.func @_encoder_kernel(%arg0: i32, %arg1: memref<16x32xf32, #tpu.memory_space<vmem>>, %arg2: memref<2x8xf32, #tpu.memory_space<vmem>>, %arg3: memref<1x32xf32, #tpu.memory_space<vmem>>, %arg4: memref<1x32xf32, #tpu.memory_space<vmem>>, %arg5: memref<2x32x96xf32, #tpu.memory_space<vmem>>, %arg6: memref<2x1x96xf32, #tpu.memory_space<vmem>>, %arg7: memref<2x32x32xf32, #tpu.memory_space<vmem>>, %arg8: memref<2x1x32xf32, #tpu.memory_space<vmem>>, %arg9: memref<2x1x32xf32, #tpu.memory_space<vmem>>, %arg10: memref<2x1x32xf32, #tpu.memory_space<vmem>>, %arg11: memref<2x32x64xf32, #tpu.memory_space<vmem>>, %arg12: memref<2x1x64xf32, #tpu.memory_space<vmem>>, %arg13: memref<2x64x32xf32, #tpu.memory_space<vmem>>, %arg14: memref<2x1x32xf32, #tpu.memory_space<vmem>>, %arg15: memref<2x1x32xf32, #tpu.memory_space<vmem>>, %arg16: memref<2x1x32xf32, #tpu.memory_space<vmem>>, %arg17: memref<32x16xf32, #tpu.memory_space<vmem>>, %arg18: memref<1x16xf32, #tpu.memory_space<vmem>>, %arg19: memref<2x16xf32, #tpu.memory_space<vmem>>, %arg20: memref<16x32xf32, #tpu.memory_space<vmem>>) attributes {dimension_semantics = [#tpu.dimension_semantics<arbitrary>], iteration_bounds = array<i64: 1>, scalar_prefetch = 0 : i64, scratch_operands = 1 : i64, tpu.core_type = #tpu.core_type<tc>, window_params = [{pipeline_mode = #tpu.pipeline_mode<synchronous>, transform_indices = @transform_0, window_bounds = array<i64: 16, 32>}, {pipeline_mode = #tpu.pipeline_mode<synchronous>, transform_indices = @transform_1, window_bounds = array<i64: 2, 8>}, {pipeline_mode = #tpu.pipeline_mode<synchronous>, transform_indices = @transform_2, window_bounds = array<i64: 1, 32>}, {pipeline_mode = #tpu.pipeline_mode<synchronous>, transform_indices = @transform_3, window_bounds = array<i64: 1, 32>}, {pipeline_mode = #tpu.pipeline_mode<synchronous>, transform_indices = @transform_4, window_bounds = array<i64: 2, 32, 96>}, {pipeline_mode = #tpu.pipeline_mode<synchronous>, transform_indices = @transform_5, window_bounds = array<i64: 2, 1, 96>}, {pipeline_mode = #tpu.pipeline_mode<synchronous>, transform_indices = @transform_6, window_bounds = array<i64: 2, 32, 32>}, {pipeline_mode = #tpu.pipeline_mode<synchronous>, transform_indices = @transform_7, window_bounds = array<i64: 2, 1, 32>}, {pipeline_mode = #tpu.pipeline_mode<synchronous>, transform_indices = @transform_8, window_bounds = array<i64: 2, 1, 32>}, {pipeline_mode = #tpu.pipeline_mode<synchronous>, transform_indices = @transform_9, window_bounds = array<i64: 2, 1, 32>}, {pipeline_mode = #tpu.pipeline_mode<synchronous>, transform_indices = @transform_10, window_bounds = array<i64: 2, 32, 64>}, {pipeline_mode = #tpu.pipeline_mode<synchronous>, transform_indices = @transform_11, window_bounds = array<i64: 2, 1, 64>}, {pipeline_mode = #tpu.pipeline_mode<synchronous>, transform_indices = @transform_12, window_bounds = array<i64: 2, 64, 32>}, {pipeline_mode = #tpu.pipeline_mode<synchronous>, transform_indices = @transform_13, window_bounds = array<i64: 2, 1, 32>}, {pipeline_mode = #tpu.pipeline_mode<synchronous>, transform_indices = @transform_14, window_bounds = array<i64: 2, 1, 32>}, {pipeline_mode = #tpu.pipeline_mode<synchronous>, transform_indices = @transform_15, window_bounds = array<i64: 2, 1, 32>}, {pipeline_mode = #tpu.pipeline_mode<synchronous>, transform_indices = @transform_16, window_bounds = array<i64: 32, 16>}, {pipeline_mode = #tpu.pipeline_mode<synchronous>, transform_indices = @transform_17, window_bounds = array<i64: 1, 16>}, {pipeline_mode = #tpu.pipeline_mode<synchronous>, transform_indices = @transform_18, window_bounds = array<i64: 2, 16>}]} {
    %c0 = arith.constant 0 : index
    %c0_0 = arith.constant 0 : index
    %0 = vector.load %arg1[%c0, %c0_0] : memref<16x32xf32, #tpu.memory_space<vmem>>, vector<16x32xf32>
    %c0_1 = arith.constant 0 : index
    %c0_2 = arith.constant 0 : index
    %1 = vector.load %arg3[%c0_1, %c0_2] : memref<1x32xf32, #tpu.memory_space<vmem>>, vector<1x32xf32>
    %c0_3 = arith.constant 0 : index
    %c0_4 = arith.constant 0 : index
    %2 = vector.load %arg4[%c0_3, %c0_4] : memref<1x32xf32, #tpu.memory_space<vmem>>, vector<1x32xf32>
    %cst = arith.constant dense<0.000000e+00> : vector<16xf32>
    %3 = vector.multi_reduction <add>, %0, %cst [1] : vector<16x32xf32> to vector<16xf32>
    %4 = vector.shape_cast %3 : vector<16xf32> to vector<16x1xf32>
    %cst_5 = arith.constant 3.200000e+01 : f32
    %5 = vector.broadcast %cst_5 : f32 to vector<16x1xf32>
    %6 = arith.divf %4, %5 : vector<16x1xf32>
    %7 = vector.broadcast %6 : vector<16x1xf32> to vector<16x32xf32>
    %8 = arith.subf %0, %7 : vector<16x32xf32>
    %9 = arith.mulf %8, %8 : vector<16x32xf32>
    %cst_6 = arith.constant dense<0.000000e+00> : vector<16xf32>
    %10 = vector.multi_reduction <add>, %9, %cst_6 [1] : vector<16x32xf32> to vector<16xf32>
    %11 = vector.shape_cast %10 : vector<16xf32> to vector<16x1xf32>
    %cst_7 = arith.constant 3.200000e+01 : f32
    %12 = vector.broadcast %cst_7 : f32 to vector<16x1xf32>
    %13 = arith.divf %11, %12 : vector<16x1xf32>
    %14 = vector.broadcast %6 : vector<16x1xf32> to vector<16x32xf32>
    %15 = arith.subf %0, %14 : vector<16x32xf32>
    %cst_8 = arith.constant 9.99999996E-13 : f32
    %16 = vector.broadcast %cst_8 : f32 to vector<16x1xf32>
    %17 = arith.addf %13, %16 : vector<16x1xf32>
    %18 = math.rsqrt %17 : vector<16x1xf32>
    %19 = vector.broadcast %18 : vector<16x1xf32> to vector<16x32xf32>
    %20 = arith.mulf %15, %19 : vector<16x32xf32>
    %21 = vector.broadcast %1 : vector<1x32xf32> to vector<16x32xf32>
    %22 = arith.mulf %20, %21 : vector<16x32xf32>
    %23 = vector.broadcast %2 : vector<1x32xf32> to vector<16x32xf32>
    %24 = arith.addf %22, %23 : vector<16x32xf32>
    %c0_9 = arith.constant 0 : index
    %c0_10 = arith.constant 0 : index
    %25 = vector.load %arg2[%c0_9, %c0_10] : memref<2x8xf32, #tpu.memory_space<vmem>>, vector<2x8xf32>
    %cst_11 = arith.constant 1.000000e+00 : f32
    %26 = vector.broadcast %cst_11 : f32 to vector<2x8xf32>
    %27 = arith.subf %26, %25 : vector<2x8xf32>
    %cst_12 = arith.constant -1.000000e+09 : f32
    %28 = vector.broadcast %cst_12 : f32 to vector<2x8xf32>
    %29 = arith.mulf %27, %28 : vector<2x8xf32>
    %c0_13 = arith.constant 0 : index
    %c0_14 = arith.constant 0 : index
    %c0_15 = arith.constant 0 : index
    %30 = vector.load %arg5[%c0_13, %c0_14, %c0_15] : memref<2x32x96xf32, #tpu.memory_space<vmem>>, vector<1x32x96xf32>
    %31 = vector.shape_cast %30 : vector<1x32x96xf32> to vector<32x96xf32>
    %cst_16 = arith.constant dense<0.000000e+00> : vector<16x96xf32>
    %32 = tpu.matmul %24, %31, %cst_16 {dimension_numbers = #tpu.dot_dimension_numbers<[1], [0], [0], [1], [0, 0, 1, 1], [], []>} : vector<16x32xf32>, vector<32x96xf32>, vector<16x96xf32> -> vector<16x96xf32>
    %c0_17 = arith.constant 0 : index
    %c0_18 = arith.constant 0 : index
    %c0_19 = arith.constant 0 : index
    %33 = vector.load %arg6[%c0_17, %c0_18, %c0_19] : memref<2x1x96xf32, #tpu.memory_space<vmem>>, vector<1x1x96xf32>
    %34 = vector.shape_cast %33 : vector<1x1x96xf32> to vector<1x96xf32>
    %35 = vector.broadcast %34 : vector<1x96xf32> to vector<16x96xf32>
    %36 = arith.addf %32, %35 : vector<16x96xf32>
    %37 = vector.extract_strided_slice %29 {offsets = [0, 0], sizes = [1, 8], strides = [1, 1]} : vector<2x8xf32> to vector<1x8xf32>
    %38 = vector.extract_strided_slice %36 {offsets = [0, 0], sizes = [8, 16], strides = [1, 1]} : vector<16x96xf32> to vector<8x16xf32>
    %39 = vector.extract_strided_slice %36 {offsets = [0, 32], sizes = [8, 16], strides = [1, 1]} : vector<16x96xf32> to vector<8x16xf32>
    %40 = vector.extract_strided_slice %36 {offsets = [0, 64], sizes = [8, 16], strides = [1, 1]} : vector<16x96xf32> to vector<8x16xf32>
    %cst_20 = arith.constant dense<0.000000e+00> : vector<8x8xf32>
    %41 = tpu.matmul %38, %39, %cst_20 {dimension_numbers = #tpu.dot_dimension_numbers<[1], [1], [0], [0], [0, 0, 1, 0], [], []>} : vector<8x16xf32>, vector<8x16xf32>, vector<8x8xf32> -> vector<8x8xf32>
    %42 = vector.broadcast %37 : vector<1x8xf32> to vector<8x8xf32>
    %43 = arith.addf %41, %42 : vector<8x8xf32>
    %cst_21 = arith.constant dense<0xFF800000> : vector<8xf32>
    %44 = vector.multi_reduction <maximumf>, %43, %cst_21 [1] : vector<8x8xf32> to vector<8xf32>
    %45 = vector.shape_cast %44 : vector<8xf32> to vector<8x1xf32>
    %46 = vector.broadcast %45 : vector<8x1xf32> to vector<8x8xf32>
    %47 = arith.subf %43, %46 : vector<8x8xf32>
    %48 = math.exp %47 : vector<8x8xf32>
    %cst_22 = arith.constant dense<0.000000e+00> : vector<8xf32>
    %49 = vector.multi_reduction <add>, %48, %cst_22 [1] : vector<8x8xf32> to vector<8xf32>
    %50 = vector.shape_cast %49 : vector<8xf32> to vector<8x1xf32>
    %51 = tpu.reciprocal %50 {approx = true} : vector<8x1xf32> -> vector<8x1xf32>
    %52 = vector.broadcast %51 : vector<8x1xf32> to vector<8x8xf32>
    %53 = arith.mulf %48, %52 : vector<8x8xf32>
    %cst_23 = arith.constant dense<0.000000e+00> : vector<8x16xf32>
    %54 = tpu.matmul %53, %40, %cst_23 {dimension_numbers = #tpu.dot_dimension_numbers<[1], [0], [0], [1], [0, 0, 1, 1], [], []>} : vector<8x8xf32>, vector<8x16xf32>, vector<8x16xf32> -> vector<8x16xf32>
    %c0_24 = arith.constant 0 : index
    %c0_25 = arith.constant 0 : index
    %55 = vector.load %arg20[%c0_24, %c0_25] : memref<16x32xf32, #tpu.memory_space<vmem>>, vector<8x16xf32>
    tpu.vector_store %arg20[%c0_24, %c0_25], %54 {strides = array<i32>} : memref<16x32xf32, #tpu.memory_space<vmem>>, vector<8x16xf32>,
    %56 = vector.extract_strided_slice %36 {offsets = [0, 16], sizes = [8, 16], strides = [1, 1]} : vector<16x96xf32> to vector<8x16xf32>
    %57 = vector.extract_strided_slice %36 {offsets = [0, 48], sizes = [8, 16], strides = [1, 1]} : vector<16x96xf32> to vector<8x16xf32>
    %58 = vector.extract_strided_slice %36 {offsets = [0, 80], sizes = [8, 16], strides = [1, 1]} : vector<16x96xf32> to vector<8x16xf32>
    %cst_26 = arith.constant dense<0.000000e+00> : vector<8x8xf32>
    %59 = tpu.matmul %56, %57, %cst_26 {dimension_numbers = #tpu.dot_dimension_numbers<[1], [1], [0], [0], [0, 0, 1, 0], [], []>} : vector<8x16xf32>, vector<8x16xf32>, vector<8x8xf32> -> vector<8x8xf32>
    %60 = vector.broadcast %37 : vector<1x8xf32> to vector<8x8xf32>
    %61 = arith.addf %59, %60 : vector<8x8xf32>
    %cst_27 = arith.constant dense<0xFF800000> : vector<8xf32>
    %62 = vector.multi_reduction <maximumf>, %61, %cst_27 [1] : vector<8x8xf32> to vector<8xf32>
    %63 = vector.shape_cast %62 : vector<8xf32> to vector<8x1xf32>
    %64 = vector.broadcast %63 : vector<8x1xf32> to vector<8x8xf32>
    %65 = arith.subf %61, %64 : vector<8x8xf32>
    %66 = math.exp %65 : vector<8x8xf32>
    %cst_28 = arith.constant dense<0.000000e+00> : vector<8xf32>
    %67 = vector.multi_reduction <add>, %66, %cst_28 [1] : vector<8x8xf32> to vector<8xf32>
    %68 = vector.shape_cast %67 : vector<8xf32> to vector<8x1xf32>
    %69 = tpu.reciprocal %68 {approx = true} : vector<8x1xf32> -> vector<8x1xf32>
    %70 = vector.broadcast %69 : vector<8x1xf32> to vector<8x8xf32>
    %71 = arith.mulf %66, %70 : vector<8x8xf32>
    %cst_29 = arith.constant dense<0.000000e+00> : vector<8x16xf32>
    %72 = tpu.matmul %71, %58, %cst_29 {dimension_numbers = #tpu.dot_dimension_numbers<[1], [0], [0], [1], [0, 0, 1, 1], [], []>} : vector<8x8xf32>, vector<8x16xf32>, vector<8x16xf32> -> vector<8x16xf32>
    %c0_30 = arith.constant 0 : index
    %c16 = arith.constant 16 : index
    %73 = vector.load %arg20[%c0_30, %c16] : memref<16x32xf32, #tpu.memory_space<vmem>>, vector<8x16xf32>
    tpu.vector_store %arg20[%c0_30, %c16], %72 {strides = array<i32>} : memref<16x32xf32, #tpu.memory_space<vmem>>, vector<8x16xf32>,
    %74 = vector.extract_strided_slice %29 {offsets = [1, 0], sizes = [1, 8], strides = [1, 1]} : vector<2x8xf32> to vector<1x8xf32>
    %75 = vector.extract_strided_slice %36 {offsets = [8, 0], sizes = [8, 16], strides = [1, 1]} : vector<16x96xf32> to vector<8x16xf32>
    %76 = vector.extract_strided_slice %36 {offsets = [8, 32], sizes = [8, 16], strides = [1, 1]} : vector<16x96xf32> to vector<8x16xf32>
    %77 = vector.extract_strided_slice %36 {offsets = [8, 64], sizes = [8, 16], strides = [1, 1]} : vector<16x96xf32> to vector<8x16xf32>
    %cst_31 = arith.constant dense<0.000000e+00> : vector<8x8xf32>
    %78 = tpu.matmul %75, %76, %cst_31 {dimension_numbers = #tpu.dot_dimension_numbers<[1], [1], [0], [0], [0, 0, 1, 0], [], []>} : vector<8x16xf32>, vector<8x16xf32>, vector<8x8xf32> -> vector<8x8xf32>
    %79 = vector.broadcast %74 : vector<1x8xf32> to vector<8x8xf32>
    %80 = arith.addf %78, %79 : vector<8x8xf32>
    %cst_32 = arith.constant dense<0xFF800000> : vector<8xf32>
    %81 = vector.multi_reduction <maximumf>, %80, %cst_32 [1] : vector<8x8xf32> to vector<8xf32>
    %82 = vector.shape_cast %81 : vector<8xf32> to vector<8x1xf32>
    %83 = vector.broadcast %82 : vector<8x1xf32> to vector<8x8xf32>
    %84 = arith.subf %80, %83 : vector<8x8xf32>
    %85 = math.exp %84 : vector<8x8xf32>
    %cst_33 = arith.constant dense<0.000000e+00> : vector<8xf32>
    %86 = vector.multi_reduction <add>, %85, %cst_33 [1] : vector<8x8xf32> to vector<8xf32>
    %87 = vector.shape_cast %86 : vector<8xf32> to vector<8x1xf32>
    %88 = tpu.reciprocal %87 {approx = true} : vector<8x1xf32> -> vector<8x1xf32>
    %89 = vector.broadcast %88 : vector<8x1xf32> to vector<8x8xf32>
    %90 = arith.mulf %85, %89 : vector<8x8xf32>
    %cst_34 = arith.constant dense<0.000000e+00> : vector<8x16xf32>
    %91 = tpu.matmul %90, %77, %cst_34 {dimension_numbers = #tpu.dot_dimension_numbers<[1], [0], [0], [1], [0, 0, 1, 1], [], []>} : vector<8x8xf32>, vector<8x16xf32>, vector<8x16xf32> -> vector<8x16xf32>
    %c8 = arith.constant 8 : index
    %c0_35 = arith.constant 0 : index
    %92 = vector.load %arg20[%c8, %c0_35] : memref<16x32xf32, #tpu.memory_space<vmem>>, vector<8x16xf32>
    tpu.vector_store %arg20[%c8, %c0_35], %91 {strides = array<i32>} : memref<16x32xf32, #tpu.memory_space<vmem>>, vector<8x16xf32>,
    %93 = vector.extract_strided_slice %36 {offsets = [8, 16], sizes = [8, 16], strides = [1, 1]} : vector<16x96xf32> to vector<8x16xf32>
    %94 = vector.extract_strided_slice %36 {offsets = [8, 48], sizes = [8, 16], strides = [1, 1]} : vector<16x96xf32> to vector<8x16xf32>
    %95 = vector.extract_strided_slice %36 {offsets = [8, 80], sizes = [8, 16], strides = [1, 1]} : vector<16x96xf32> to vector<8x16xf32>
    %cst_36 = arith.constant dense<0.000000e+00> : vector<8x8xf32>
    %96 = tpu.matmul %93, %94, %cst_36 {dimension_numbers = #tpu.dot_dimension_numbers<[1], [1], [0], [0], [0, 0, 1, 0], [], []>} : vector<8x16xf32>, vector<8x16xf32>, vector<8x8xf32> -> vector<8x8xf32>
    %97 = vector.broadcast %74 : vector<1x8xf32> to vector<8x8xf32>
    %98 = arith.addf %96, %97 : vector<8x8xf32>
    %cst_37 = arith.constant dense<0xFF800000> : vector<8xf32>
    %99 = vector.multi_reduction <maximumf>, %98, %cst_37 [1] : vector<8x8xf32> to vector<8xf32>
    %100 = vector.shape_cast %99 : vector<8xf32> to vector<8x1xf32>
    %101 = vector.broadcast %100 : vector<8x1xf32> to vector<8x8xf32>
    %102 = arith.subf %98, %101 : vector<8x8xf32>
    %103 = math.exp %102 : vector<8x8xf32>
    %cst_38 = arith.constant dense<0.000000e+00> : vector<8xf32>
    %104 = vector.multi_reduction <add>, %103, %cst_38 [1] : vector<8x8xf32> to vector<8xf32>
    %105 = vector.shape_cast %104 : vector<8xf32> to vector<8x1xf32>
    %106 = tpu.reciprocal %105 {approx = true} : vector<8x1xf32> -> vector<8x1xf32>
    %107 = vector.broadcast %106 : vector<8x1xf32> to vector<8x8xf32>
    %108 = arith.mulf %103, %107 : vector<8x8xf32>
    %cst_39 = arith.constant dense<0.000000e+00> : vector<8x16xf32>
    %109 = tpu.matmul %108, %95, %cst_39 {dimension_numbers = #tpu.dot_dimension_numbers<[1], [0], [0], [1], [0, 0, 1, 1], [], []>} : vector<8x8xf32>, vector<8x16xf32>, vector<8x16xf32> -> vector<8x16xf32>
    %c8_40 = arith.constant 8 : index
    %c16_41 = arith.constant 16 : index
    %110 = vector.load %arg20[%c8_40, %c16_41] : memref<16x32xf32, #tpu.memory_space<vmem>>, vector<8x16xf32>
    tpu.vector_store %arg20[%c8_40, %c16_41], %109 {strides = array<i32>} : memref<16x32xf32, #tpu.memory_space<vmem>>, vector<8x16xf32>,
    %c0_42 = arith.constant 0 : index
    %c0_43 = arith.constant 0 : index
    %111 = vector.load %arg20[%c0_42, %c0_43] : memref<16x32xf32, #tpu.memory_space<vmem>>, vector<16x32xf32>
    %c0_44 = arith.constant 0 : index
    %c0_45 = arith.constant 0 : index
    %c0_46 = arith.constant 0 : index
    %112 = vector.load %arg7[%c0_44, %c0_45, %c0_46] : memref<2x32x32xf32, #tpu.memory_space<vmem>>, vector<1x32x32xf32>
    %113 = vector.shape_cast %112 : vector<1x32x32xf32> to vector<32x32xf32>
    %cst_47 = arith.constant dense<0.000000e+00> : vector<16x32xf32>
    %114 = tpu.matmul %111, %113, %cst_47 {dimension_numbers = #tpu.dot_dimension_numbers<[1], [0], [0], [1], [0, 0, 1, 1], [], []>} : vector<16x32xf32>, vector<32x32xf32>, vector<16x32xf32> -> vector<16x32xf32>
    %c0_48 = arith.constant 0 : index
    %c0_49 = arith.constant 0 : index
    %c0_50 = arith.constant 0 : index
    %115 = vector.load %arg8[%c0_48, %c0_49, %c0_50] : memref<2x1x32xf32, #tpu.memory_space<vmem>>, vector<1x1x32xf32>
    %116 = vector.shape_cast %115 : vector<1x1x32xf32> to vector<1x32xf32>
    %117 = vector.broadcast %116 : vector<1x32xf32> to vector<16x32xf32>
    %118 = arith.addf %114, %117 : vector<16x32xf32>
    %119 = arith.addf %118, %24 : vector<16x32xf32>
    %c0_51 = arith.constant 0 : index
    %c0_52 = arith.constant 0 : index
    %c0_53 = arith.constant 0 : index
    %120 = vector.load %arg9[%c0_51, %c0_52, %c0_53] : memref<2x1x32xf32, #tpu.memory_space<vmem>>, vector<1x1x32xf32>
    %121 = vector.shape_cast %120 : vector<1x1x32xf32> to vector<1x32xf32>
    %c0_54 = arith.constant 0 : index
    %c0_55 = arith.constant 0 : index
    %c0_56 = arith.constant 0 : index
    %122 = vector.load %arg10[%c0_54, %c0_55, %c0_56] : memref<2x1x32xf32, #tpu.memory_space<vmem>>, vector<1x1x32xf32>
    %123 = vector.shape_cast %122 : vector<1x1x32xf32> to vector<1x32xf32>
    %cst_57 = arith.constant dense<0.000000e+00> : vector<16xf32>
    %124 = vector.multi_reduction <add>, %119, %cst_57 [1] : vector<16x32xf32> to vector<16xf32>
    %125 = vector.shape_cast %124 : vector<16xf32> to vector<16x1xf32>
    %cst_58 = arith.constant 3.200000e+01 : f32
    %126 = vector.broadcast %cst_58 : f32 to vector<16x1xf32>
    %127 = arith.divf %125, %126 : vector<16x1xf32>
    %128 = vector.broadcast %127 : vector<16x1xf32> to vector<16x32xf32>
    %129 = arith.subf %119, %128 : vector<16x32xf32>
    %130 = arith.mulf %129, %129 : vector<16x32xf32>
    %cst_59 = arith.constant dense<0.000000e+00> : vector<16xf32>
    %131 = vector.multi_reduction <add>, %130, %cst_59 [1] : vector<16x32xf32> to vector<16xf32>
    %132 = vector.shape_cast %131 : vector<16xf32> to vector<16x1xf32>
    %cst_60 = arith.constant 3.200000e+01 : f32
    %133 = vector.broadcast %cst_60 : f32 to vector<16x1xf32>
    %134 = arith.divf %132, %133 : vector<16x1xf32>
    %135 = vector.broadcast %127 : vector<16x1xf32> to vector<16x32xf32>
    %136 = arith.subf %119, %135 : vector<16x32xf32>
    %cst_61 = arith.constant 9.99999996E-13 : f32
    %137 = vector.broadcast %cst_61 : f32 to vector<16x1xf32>
    %138 = arith.addf %134, %137 : vector<16x1xf32>
    %139 = math.rsqrt %138 : vector<16x1xf32>
    %140 = vector.broadcast %139 : vector<16x1xf32> to vector<16x32xf32>
    %141 = arith.mulf %136, %140 : vector<16x32xf32>
    %142 = vector.broadcast %121 : vector<1x32xf32> to vector<16x32xf32>
    %143 = arith.mulf %141, %142 : vector<16x32xf32>
    %144 = vector.broadcast %123 : vector<1x32xf32> to vector<16x32xf32>
    %145 = arith.addf %143, %144 : vector<16x32xf32>
    %c0_62 = arith.constant 0 : index
    %c0_63 = arith.constant 0 : index
    %c0_64 = arith.constant 0 : index
    %146 = vector.load %arg11[%c0_62, %c0_63, %c0_64] : memref<2x32x64xf32, #tpu.memory_space<vmem>>, vector<1x32x64xf32>
    %147 = vector.shape_cast %146 : vector<1x32x64xf32> to vector<32x64xf32>
    %cst_65 = arith.constant dense<0.000000e+00> : vector<16x64xf32>
    %148 = tpu.matmul %145, %147, %cst_65 {dimension_numbers = #tpu.dot_dimension_numbers<[1], [0], [0], [1], [0, 0, 1, 1], [], []>} : vector<16x32xf32>, vector<32x64xf32>, vector<16x64xf32> -> vector<16x64xf32>
    %c0_66 = arith.constant 0 : index
    %c0_67 = arith.constant 0 : index
    %c0_68 = arith.constant 0 : index
    %149 = vector.load %arg12[%c0_66, %c0_67, %c0_68] : memref<2x1x64xf32, #tpu.memory_space<vmem>>, vector<1x1x64xf32>
    %150 = vector.shape_cast %149 : vector<1x1x64xf32> to vector<1x64xf32>
    %151 = vector.broadcast %150 : vector<1x64xf32> to vector<16x64xf32>
    %152 = arith.addf %148, %151 : vector<16x64xf32>
    %153 = arith.mulf %152, %152 : vector<16x64xf32>
    %154 = arith.mulf %152, %153 : vector<16x64xf32>
    %cst_69 = arith.constant 4.471500e-02 : f32
    %155 = vector.broadcast %cst_69 : f32 to vector<16x64xf32>
    %156 = arith.mulf %155, %154 : vector<16x64xf32>
    %157 = arith.addf %152, %156 : vector<16x64xf32>
    %cst_70 = arith.constant 0.797884583 : f32
    %158 = vector.broadcast %cst_70 : f32 to vector<16x64xf32>
    %159 = arith.mulf %158, %157 : vector<16x64xf32>
    %160 = math.tanh %159 : vector<16x64xf32>
    %cst_71 = arith.constant 1.000000e+00 : f32
    %161 = vector.broadcast %cst_71 : f32 to vector<16x64xf32>
    %162 = arith.addf %161, %160 : vector<16x64xf32>
    %cst_72 = arith.constant 5.000000e-01 : f32
    %163 = vector.broadcast %cst_72 : f32 to vector<16x64xf32>
    %164 = arith.mulf %163, %162 : vector<16x64xf32>
    %165 = arith.mulf %152, %164 : vector<16x64xf32>
    %c0_73 = arith.constant 0 : index
    %c0_74 = arith.constant 0 : index
    %c0_75 = arith.constant 0 : index
    %166 = vector.load %arg13[%c0_73, %c0_74, %c0_75] : memref<2x64x32xf32, #tpu.memory_space<vmem>>, vector<1x64x32xf32>
    %167 = vector.shape_cast %166 : vector<1x64x32xf32> to vector<64x32xf32>
    %cst_76 = arith.constant dense<0.000000e+00> : vector<16x32xf32>
    %168 = tpu.matmul %165, %167, %cst_76 {dimension_numbers = #tpu.dot_dimension_numbers<[1], [0], [0], [1], [0, 0, 1, 1], [], []>} : vector<16x64xf32>, vector<64x32xf32>, vector<16x32xf32> -> vector<16x32xf32>
    %c0_77 = arith.constant 0 : index
    %c0_78 = arith.constant 0 : index
    %c0_79 = arith.constant 0 : index
    %169 = vector.load %arg14[%c0_77, %c0_78, %c0_79] : memref<2x1x32xf32, #tpu.memory_space<vmem>>, vector<1x1x32xf32>
    %170 = vector.shape_cast %169 : vector<1x1x32xf32> to vector<1x32xf32>
    %171 = vector.broadcast %170 : vector<1x32xf32> to vector<16x32xf32>
    %172 = arith.addf %168, %171 : vector<16x32xf32>
    %173 = arith.addf %172, %145 : vector<16x32xf32>
    %c0_80 = arith.constant 0 : index
    %c0_81 = arith.constant 0 : index
    %c0_82 = arith.constant 0 : index
    %174 = vector.load %arg15[%c0_80, %c0_81, %c0_82] : memref<2x1x32xf32, #tpu.memory_space<vmem>>, vector<1x1x32xf32>
    %175 = vector.shape_cast %174 : vector<1x1x32xf32> to vector<1x32xf32>
    %c0_83 = arith.constant 0 : index
    %c0_84 = arith.constant 0 : index
    %c0_85 = arith.constant 0 : index
    %176 = vector.load %arg16[%c0_83, %c0_84, %c0_85] : memref<2x1x32xf32, #tpu.memory_space<vmem>>, vector<1x1x32xf32>
    %177 = vector.shape_cast %176 : vector<1x1x32xf32> to vector<1x32xf32>
    %cst_86 = arith.constant dense<0.000000e+00> : vector<16xf32>
    %178 = vector.multi_reduction <add>, %173, %cst_86 [1] : vector<16x32xf32> to vector<16xf32>
    %179 = vector.shape_cast %178 : vector<16xf32> to vector<16x1xf32>
    %cst_87 = arith.constant 3.200000e+01 : f32
    %180 = vector.broadcast %cst_87 : f32 to vector<16x1xf32>
    %181 = arith.divf %179, %180 : vector<16x1xf32>
    %182 = vector.broadcast %181 : vector<16x1xf32> to vector<16x32xf32>
    %183 = arith.subf %173, %182 : vector<16x32xf32>
    %184 = arith.mulf %183, %183 : vector<16x32xf32>
    %cst_88 = arith.constant dense<0.000000e+00> : vector<16xf32>
    %185 = vector.multi_reduction <add>, %184, %cst_88 [1] : vector<16x32xf32> to vector<16xf32>
    %186 = vector.shape_cast %185 : vector<16xf32> to vector<16x1xf32>
    %cst_89 = arith.constant 3.200000e+01 : f32
    %187 = vector.broadcast %cst_89 : f32 to vector<16x1xf32>
    %188 = arith.divf %186, %187 : vector<16x1xf32>
    %189 = vector.broadcast %181 : vector<16x1xf32> to vector<16x32xf32>
    %190 = arith.subf %173, %189 : vector<16x32xf32>
    %cst_90 = arith.constant 9.99999996E-13 : f32
    %191 = vector.broadcast %cst_90 : f32 to vector<16x1xf32>
    %192 = arith.addf %188, %191 : vector<16x1xf32>
    %193 = math.rsqrt %192 : vector<16x1xf32>
    %194 = vector.broadcast %193 : vector<16x1xf32> to vector<16x32xf32>
    %195 = arith.mulf %190, %194 : vector<16x32xf32>
    %196 = vector.broadcast %175 : vector<1x32xf32> to vector<16x32xf32>
    %197 = arith.mulf %195, %196 : vector<16x32xf32>
    %198 = vector.broadcast %177 : vector<1x32xf32> to vector<16x32xf32>
    %199 = arith.addf %197, %198 : vector<16x32xf32>
    %c1 = arith.constant 1 : index
    %c0_91 = arith.constant 0 : index
    %c0_92 = arith.constant 0 : index
    %200 = vector.load %arg5[%c1, %c0_91, %c0_92] : memref<2x32x96xf32, #tpu.memory_space<vmem>>, vector<1x32x96xf32>
    %201 = vector.shape_cast %200 : vector<1x32x96xf32> to vector<32x96xf32>
    %cst_93 = arith.constant dense<0.000000e+00> : vector<16x96xf32>
    %202 = tpu.matmul %199, %201, %cst_93 {dimension_numbers = #tpu.dot_dimension_numbers<[1], [0], [0], [1], [0, 0, 1, 1], [], []>} : vector<16x32xf32>, vector<32x96xf32>, vector<16x96xf32> -> vector<16x96xf32>
    %c1_94 = arith.constant 1 : index
    %c0_95 = arith.constant 0 : index
    %c0_96 = arith.constant 0 : index
    %203 = vector.load %arg6[%c1_94, %c0_95, %c0_96] : memref<2x1x96xf32, #tpu.memory_space<vmem>>, vector<1x1x96xf32>
    %204 = vector.shape_cast %203 : vector<1x1x96xf32> to vector<1x96xf32>
    %205 = vector.broadcast %204 : vector<1x96xf32> to vector<16x96xf32>
    %206 = arith.addf %202, %205 : vector<16x96xf32>
    %207 = vector.extract_strided_slice %29 {offsets = [0, 0], sizes = [1, 8], strides = [1, 1]} : vector<2x8xf32> to vector<1x8xf32>
    %208 = vector.extract_strided_slice %206 {offsets = [0, 0], sizes = [8, 16], strides = [1, 1]} : vector<16x96xf32> to vector<8x16xf32>
    %209 = vector.extract_strided_slice %206 {offsets = [0, 32], sizes = [8, 16], strides = [1, 1]} : vector<16x96xf32> to vector<8x16xf32>
    %210 = vector.extract_strided_slice %206 {offsets = [0, 64], sizes = [8, 16], strides = [1, 1]} : vector<16x96xf32> to vector<8x16xf32>
    %cst_97 = arith.constant dense<0.000000e+00> : vector<8x8xf32>
    %211 = tpu.matmul %208, %209, %cst_97 {dimension_numbers = #tpu.dot_dimension_numbers<[1], [1], [0], [0], [0, 0, 1, 0], [], []>} : vector<8x16xf32>, vector<8x16xf32>, vector<8x8xf32> -> vector<8x8xf32>
    %212 = vector.broadcast %207 : vector<1x8xf32> to vector<8x8xf32>
    %213 = arith.addf %211, %212 : vector<8x8xf32>
    %cst_98 = arith.constant dense<0xFF800000> : vector<8xf32>
    %214 = vector.multi_reduction <maximumf>, %213, %cst_98 [1] : vector<8x8xf32> to vector<8xf32>
    %215 = vector.shape_cast %214 : vector<8xf32> to vector<8x1xf32>
    %216 = vector.broadcast %215 : vector<8x1xf32> to vector<8x8xf32>
    %217 = arith.subf %213, %216 : vector<8x8xf32>
    %218 = math.exp %217 : vector<8x8xf32>
    %cst_99 = arith.constant dense<0.000000e+00> : vector<8xf32>
    %219 = vector.multi_reduction <add>, %218, %cst_99 [1] : vector<8x8xf32> to vector<8xf32>
    %220 = vector.shape_cast %219 : vector<8xf32> to vector<8x1xf32>
    %221 = tpu.reciprocal %220 {approx = true} : vector<8x1xf32> -> vector<8x1xf32>
    %222 = vector.broadcast %221 : vector<8x1xf32> to vector<8x8xf32>
    %223 = arith.mulf %218, %222 : vector<8x8xf32>
    %cst_100 = arith.constant dense<0.000000e+00> : vector<8x16xf32>
    %224 = tpu.matmul %223, %210, %cst_100 {dimension_numbers = #tpu.dot_dimension_numbers<[1], [0], [0], [1], [0, 0, 1, 1], [], []>} : vector<8x8xf32>, vector<8x16xf32>, vector<8x16xf32> -> vector<8x16xf32>
    %c0_101 = arith.constant 0 : index
    %c0_102 = arith.constant 0 : index
    %225 = vector.load %arg20[%c0_101, %c0_102] : memref<16x32xf32, #tpu.memory_space<vmem>>, vector<8x16xf32>
    tpu.vector_store %arg20[%c0_101, %c0_102], %224 {strides = array<i32>} : memref<16x32xf32, #tpu.memory_space<vmem>>, vector<8x16xf32>,
    %226 = vector.extract_strided_slice %206 {offsets = [0, 16], sizes = [8, 16], strides = [1, 1]} : vector<16x96xf32> to vector<8x16xf32>
    %227 = vector.extract_strided_slice %206 {offsets = [0, 48], sizes = [8, 16], strides = [1, 1]} : vector<16x96xf32> to vector<8x16xf32>
    %228 = vector.extract_strided_slice %206 {offsets = [0, 80], sizes = [8, 16], strides = [1, 1]} : vector<16x96xf32> to vector<8x16xf32>
    %cst_103 = arith.constant dense<0.000000e+00> : vector<8x8xf32>
    %229 = tpu.matmul %226, %227, %cst_103 {dimension_numbers = #tpu.dot_dimension_numbers<[1], [1], [0], [0], [0, 0, 1, 0], [], []>} : vector<8x16xf32>, vector<8x16xf32>, vector<8x8xf32> -> vector<8x8xf32>
    %230 = vector.broadcast %207 : vector<1x8xf32> to vector<8x8xf32>
    %231 = arith.addf %229, %230 : vector<8x8xf32>
    %cst_104 = arith.constant dense<0xFF800000> : vector<8xf32>
    %232 = vector.multi_reduction <maximumf>, %231, %cst_104 [1] : vector<8x8xf32> to vector<8xf32>
    %233 = vector.shape_cast %232 : vector<8xf32> to vector<8x1xf32>
    %234 = vector.broadcast %233 : vector<8x1xf32> to vector<8x8xf32>
    %235 = arith.subf %231, %234 : vector<8x8xf32>
    %236 = math.exp %235 : vector<8x8xf32>
    %cst_105 = arith.constant dense<0.000000e+00> : vector<8xf32>
    %237 = vector.multi_reduction <add>, %236, %cst_105 [1] : vector<8x8xf32> to vector<8xf32>
    %238 = vector.shape_cast %237 : vector<8xf32> to vector<8x1xf32>
    %239 = tpu.reciprocal %238 {approx = true} : vector<8x1xf32> -> vector<8x1xf32>
    %240 = vector.broadcast %239 : vector<8x1xf32> to vector<8x8xf32>
    %241 = arith.mulf %236, %240 : vector<8x8xf32>
    %cst_106 = arith.constant dense<0.000000e+00> : vector<8x16xf32>
    %242 = tpu.matmul %241, %228, %cst_106 {dimension_numbers = #tpu.dot_dimension_numbers<[1], [0], [0], [1], [0, 0, 1, 1], [], []>} : vector<8x8xf32>, vector<8x16xf32>, vector<8x16xf32> -> vector<8x16xf32>
    %c0_107 = arith.constant 0 : index
    %c16_108 = arith.constant 16 : index
    %243 = vector.load %arg20[%c0_107, %c16_108] : memref<16x32xf32, #tpu.memory_space<vmem>>, vector<8x16xf32>
    tpu.vector_store %arg20[%c0_107, %c16_108], %242 {strides = array<i32>} : memref<16x32xf32, #tpu.memory_space<vmem>>, vector<8x16xf32>,
    %244 = vector.extract_strided_slice %29 {offsets = [1, 0], sizes = [1, 8], strides = [1, 1]} : vector<2x8xf32> to vector<1x8xf32>
    %245 = vector.extract_strided_slice %206 {offsets = [8, 0], sizes = [8, 16], strides = [1, 1]} : vector<16x96xf32> to vector<8x16xf32>
    %246 = vector.extract_strided_slice %206 {offsets = [8, 32], sizes = [8, 16], strides = [1, 1]} : vector<16x96xf32> to vector<8x16xf32>
    %247 = vector.extract_strided_slice %206 {offsets = [8, 64], sizes = [8, 16], strides = [1, 1]} : vector<16x96xf32> to vector<8x16xf32>
    %cst_109 = arith.constant dense<0.000000e+00> : vector<8x8xf32>
    %248 = tpu.matmul %245, %246, %cst_109 {dimension_numbers = #tpu.dot_dimension_numbers<[1], [1], [0], [0], [0, 0, 1, 0], [], []>} : vector<8x16xf32>, vector<8x16xf32>, vector<8x8xf32> -> vector<8x8xf32>
    %249 = vector.broadcast %244 : vector<1x8xf32> to vector<8x8xf32>
    %250 = arith.addf %248, %249 : vector<8x8xf32>
    %cst_110 = arith.constant dense<0xFF800000> : vector<8xf32>
    %251 = vector.multi_reduction <maximumf>, %250, %cst_110 [1] : vector<8x8xf32> to vector<8xf32>
    %252 = vector.shape_cast %251 : vector<8xf32> to vector<8x1xf32>
    %253 = vector.broadcast %252 : vector<8x1xf32> to vector<8x8xf32>
    %254 = arith.subf %250, %253 : vector<8x8xf32>
    %255 = math.exp %254 : vector<8x8xf32>
    %cst_111 = arith.constant dense<0.000000e+00> : vector<8xf32>
    %256 = vector.multi_reduction <add>, %255, %cst_111 [1] : vector<8x8xf32> to vector<8xf32>
    %257 = vector.shape_cast %256 : vector<8xf32> to vector<8x1xf32>
    %258 = tpu.reciprocal %257 {approx = true} : vector<8x1xf32> -> vector<8x1xf32>
    %259 = vector.broadcast %258 : vector<8x1xf32> to vector<8x8xf32>
    %260 = arith.mulf %255, %259 : vector<8x8xf32>
    %cst_112 = arith.constant dense<0.000000e+00> : vector<8x16xf32>
    %261 = tpu.matmul %260, %247, %cst_112 {dimension_numbers = #tpu.dot_dimension_numbers<[1], [0], [0], [1], [0, 0, 1, 1], [], []>} : vector<8x8xf32>, vector<8x16xf32>, vector<8x16xf32> -> vector<8x16xf32>
    %c8_113 = arith.constant 8 : index
    %c0_114 = arith.constant 0 : index
    %262 = vector.load %arg20[%c8_113, %c0_114] : memref<16x32xf32, #tpu.memory_space<vmem>>, vector<8x16xf32>
    tpu.vector_store %arg20[%c8_113, %c0_114], %261 {strides = array<i32>} : memref<16x32xf32, #tpu.memory_space<vmem>>, vector<8x16xf32>,
    %263 = vector.extract_strided_slice %206 {offsets = [8, 16], sizes = [8, 16], strides = [1, 1]} : vector<16x96xf32> to vector<8x16xf32>
    %264 = vector.extract_strided_slice %206 {offsets = [8, 48], sizes = [8, 16], strides = [1, 1]} : vector<16x96xf32> to vector<8x16xf32>
    %265 = vector.extract_strided_slice %206 {offsets = [8, 80], sizes = [8, 16], strides = [1, 1]} : vector<16x96xf32> to vector<8x16xf32>
    %cst_115 = arith.constant dense<0.000000e+00> : vector<8x8xf32>
    %266 = tpu.matmul %263, %264, %cst_115 {dimension_numbers = #tpu.dot_dimension_numbers<[1], [1], [0], [0], [0, 0, 1, 0], [], []>} : vector<8x16xf32>, vector<8x16xf32>, vector<8x8xf32> -> vector<8x8xf32>
    %267 = vector.broadcast %244 : vector<1x8xf32> to vector<8x8xf32>
    %268 = arith.addf %266, %267 : vector<8x8xf32>
    %cst_116 = arith.constant dense<0xFF800000> : vector<8xf32>
    %269 = vector.multi_reduction <maximumf>, %268, %cst_116 [1] : vector<8x8xf32> to vector<8xf32>
    %270 = vector.shape_cast %269 : vector<8xf32> to vector<8x1xf32>
    %271 = vector.broadcast %270 : vector<8x1xf32> to vector<8x8xf32>
    %272 = arith.subf %268, %271 : vector<8x8xf32>
    %273 = math.exp %272 : vector<8x8xf32>
    %cst_117 = arith.constant dense<0.000000e+00> : vector<8xf32>
    %274 = vector.multi_reduction <add>, %273, %cst_117 [1] : vector<8x8xf32> to vector<8xf32>
    %275 = vector.shape_cast %274 : vector<8xf32> to vector<8x1xf32>
    %276 = tpu.reciprocal %275 {approx = true} : vector<8x1xf32> -> vector<8x1xf32>
    %277 = vector.broadcast %276 : vector<8x1xf32> to vector<8x8xf32>
    %278 = arith.mulf %273, %277 : vector<8x8xf32>
    %cst_118 = arith.constant dense<0.000000e+00> : vector<8x16xf32>
    %279 = tpu.matmul %278, %265, %cst_118 {dimension_numbers = #tpu.dot_dimension_numbers<[1], [0], [0], [1], [0, 0, 1, 1], [], []>} : vector<8x8xf32>, vector<8x16xf32>, vector<8x16xf32> -> vector<8x16xf32>
    %c8_119 = arith.constant 8 : index
    %c16_120 = arith.constant 16 : index
    %280 = vector.load %arg20[%c8_119, %c16_120] : memref<16x32xf32, #tpu.memory_space<vmem>>, vector<8x16xf32>
    tpu.vector_store %arg20[%c8_119, %c16_120], %279 {strides = array<i32>} : memref<16x32xf32, #tpu.memory_space<vmem>>, vector<8x16xf32>,
    %c0_121 = arith.constant 0 : index
    %c0_122 = arith.constant 0 : index
    %281 = vector.load %arg20[%c0_121, %c0_122] : memref<16x32xf32, #tpu.memory_space<vmem>>, vector<16x32xf32>
    %c1_123 = arith.constant 1 : index
    %c0_124 = arith.constant 0 : index
    %c0_125 = arith.constant 0 : index
    %282 = vector.load %arg7[%c1_123, %c0_124, %c0_125] : memref<2x32x32xf32, #tpu.memory_space<vmem>>, vector<1x32x32xf32>
    %283 = vector.shape_cast %282 : vector<1x32x32xf32> to vector<32x32xf32>
    %cst_126 = arith.constant dense<0.000000e+00> : vector<16x32xf32>
    %284 = tpu.matmul %281, %283, %cst_126 {dimension_numbers = #tpu.dot_dimension_numbers<[1], [0], [0], [1], [0, 0, 1, 1], [], []>} : vector<16x32xf32>, vector<32x32xf32>, vector<16x32xf32> -> vector<16x32xf32>
    %c1_127 = arith.constant 1 : index
    %c0_128 = arith.constant 0 : index
    %c0_129 = arith.constant 0 : index
    %285 = vector.load %arg8[%c1_127, %c0_128, %c0_129] : memref<2x1x32xf32, #tpu.memory_space<vmem>>, vector<1x1x32xf32>
    %286 = vector.shape_cast %285 : vector<1x1x32xf32> to vector<1x32xf32>
    %287 = vector.broadcast %286 : vector<1x32xf32> to vector<16x32xf32>
    %288 = arith.addf %284, %287 : vector<16x32xf32>
    %289 = arith.addf %288, %199 : vector<16x32xf32>
    %c1_130 = arith.constant 1 : index
    %c0_131 = arith.constant 0 : index
    %c0_132 = arith.constant 0 : index
    %290 = vector.load %arg9[%c1_130, %c0_131, %c0_132] : memref<2x1x32xf32, #tpu.memory_space<vmem>>, vector<1x1x32xf32>
    %291 = vector.shape_cast %290 : vector<1x1x32xf32> to vector<1x32xf32>
    %c1_133 = arith.constant 1 : index
    %c0_134 = arith.constant 0 : index
    %c0_135 = arith.constant 0 : index
    %292 = vector.load %arg10[%c1_133, %c0_134, %c0_135] : memref<2x1x32xf32, #tpu.memory_space<vmem>>, vector<1x1x32xf32>
    %293 = vector.shape_cast %292 : vector<1x1x32xf32> to vector<1x32xf32>
    %cst_136 = arith.constant dense<0.000000e+00> : vector<16xf32>
    %294 = vector.multi_reduction <add>, %289, %cst_136 [1] : vector<16x32xf32> to vector<16xf32>
    %295 = vector.shape_cast %294 : vector<16xf32> to vector<16x1xf32>
    %cst_137 = arith.constant 3.200000e+01 : f32
    %296 = vector.broadcast %cst_137 : f32 to vector<16x1xf32>
    %297 = arith.divf %295, %296 : vector<16x1xf32>
    %298 = vector.broadcast %297 : vector<16x1xf32> to vector<16x32xf32>
    %299 = arith.subf %289, %298 : vector<16x32xf32>
    %300 = arith.mulf %299, %299 : vector<16x32xf32>
    %cst_138 = arith.constant dense<0.000000e+00> : vector<16xf32>
    %301 = vector.multi_reduction <add>, %300, %cst_138 [1] : vector<16x32xf32> to vector<16xf32>
    %302 = vector.shape_cast %301 : vector<16xf32> to vector<16x1xf32>
    %cst_139 = arith.constant 3.200000e+01 : f32
    %303 = vector.broadcast %cst_139 : f32 to vector<16x1xf32>
    %304 = arith.divf %302, %303 : vector<16x1xf32>
    %305 = vector.broadcast %297 : vector<16x1xf32> to vector<16x32xf32>
    %306 = arith.subf %289, %305 : vector<16x32xf32>
    %cst_140 = arith.constant 9.99999996E-13 : f32
    %307 = vector.broadcast %cst_140 : f32 to vector<16x1xf32>
    %308 = arith.addf %304, %307 : vector<16x1xf32>
    %309 = math.rsqrt %308 : vector<16x1xf32>
    %310 = vector.broadcast %309 : vector<16x1xf32> to vector<16x32xf32>
    %311 = arith.mulf %306, %310 : vector<16x32xf32>
    %312 = vector.broadcast %291 : vector<1x32xf32> to vector<16x32xf32>
    %313 = arith.mulf %311, %312 : vector<16x32xf32>
    %314 = vector.broadcast %293 : vector<1x32xf32> to vector<16x32xf32>
    %315 = arith.addf %313, %314 : vector<16x32xf32>
    %c1_141 = arith.constant 1 : index
    %c0_142 = arith.constant 0 : index
    %c0_143 = arith.constant 0 : index
    %316 = vector.load %arg11[%c1_141, %c0_142, %c0_143] : memref<2x32x64xf32, #tpu.memory_space<vmem>>, vector<1x32x64xf32>
    %317 = vector.shape_cast %316 : vector<1x32x64xf32> to vector<32x64xf32>
    %cst_144 = arith.constant dense<0.000000e+00> : vector<16x64xf32>
    %318 = tpu.matmul %315, %317, %cst_144 {dimension_numbers = #tpu.dot_dimension_numbers<[1], [0], [0], [1], [0, 0, 1, 1], [], []>} : vector<16x32xf32>, vector<32x64xf32>, vector<16x64xf32> -> vector<16x64xf32>
    %c1_145 = arith.constant 1 : index
    %c0_146 = arith.constant 0 : index
    %c0_147 = arith.constant 0 : index
    %319 = vector.load %arg12[%c1_145, %c0_146, %c0_147] : memref<2x1x64xf32, #tpu.memory_space<vmem>>, vector<1x1x64xf32>
    %320 = vector.shape_cast %319 : vector<1x1x64xf32> to vector<1x64xf32>
    %321 = vector.broadcast %320 : vector<1x64xf32> to vector<16x64xf32>
    %322 = arith.addf %318, %321 : vector<16x64xf32>
    %323 = arith.mulf %322, %322 : vector<16x64xf32>
    %324 = arith.mulf %322, %323 : vector<16x64xf32>
    %cst_148 = arith.constant 4.471500e-02 : f32
    %325 = vector.broadcast %cst_148 : f32 to vector<16x64xf32>
    %326 = arith.mulf %325, %324 : vector<16x64xf32>
    %327 = arith.addf %322, %326 : vector<16x64xf32>
    %cst_149 = arith.constant 0.797884583 : f32
    %328 = vector.broadcast %cst_149 : f32 to vector<16x64xf32>
    %329 = arith.mulf %328, %327 : vector<16x64xf32>
    %330 = math.tanh %329 : vector<16x64xf32>
    %cst_150 = arith.constant 1.000000e+00 : f32
    %331 = vector.broadcast %cst_150 : f32 to vector<16x64xf32>
    %332 = arith.addf %331, %330 : vector<16x64xf32>
    %cst_151 = arith.constant 5.000000e-01 : f32
    %333 = vector.broadcast %cst_151 : f32 to vector<16x64xf32>
    %334 = arith.mulf %333, %332 : vector<16x64xf32>
    %335 = arith.mulf %322, %334 : vector<16x64xf32>
    %c1_152 = arith.constant 1 : index
    %c0_153 = arith.constant 0 : index
    %c0_154 = arith.constant 0 : index
    %336 = vector.load %arg13[%c1_152, %c0_153, %c0_154] : memref<2x64x32xf32, #tpu.memory_space<vmem>>, vector<1x64x32xf32>
    %337 = vector.shape_cast %336 : vector<1x64x32xf32> to vector<64x32xf32>
    %cst_155 = arith.constant dense<0.000000e+00> : vector<16x32xf32>
    %338 = tpu.matmul %335, %337, %cst_155 {dimension_numbers = #tpu.dot_dimension_numbers<[1], [0], [0], [1], [0, 0, 1, 1], [], []>} : vector<16x64xf32>, vector<64x32xf32>, vector<16x32xf32> -> vector<16x32xf32>
    %c1_156 = arith.constant 1 : index
    %c0_157 = arith.constant 0 : index
    %c0_158 = arith.constant 0 : index
    %339 = vector.load %arg14[%c1_156, %c0_157, %c0_158] : memref<2x1x32xf32, #tpu.memory_space<vmem>>, vector<1x1x32xf32>
    %340 = vector.shape_cast %339 : vector<1x1x32xf32> to vector<1x32xf32>
    %341 = vector.broadcast %340 : vector<1x32xf32> to vector<16x32xf32>
    %342 = arith.addf %338, %341 : vector<16x32xf32>
    %343 = arith.addf %342, %315 : vector<16x32xf32>
    %c1_159 = arith.constant 1 : index
    %c0_160 = arith.constant 0 : index
    %c0_161 = arith.constant 0 : index
    %344 = vector.load %arg15[%c1_159, %c0_160, %c0_161] : memref<2x1x32xf32, #tpu.memory_space<vmem>>, vector<1x1x32xf32>
    %345 = vector.shape_cast %344 : vector<1x1x32xf32> to vector<1x32xf32>
    %c1_162 = arith.constant 1 : index
    %c0_163 = arith.constant 0 : index
    %c0_164 = arith.constant 0 : index
    %346 = vector.load %arg16[%c1_162, %c0_163, %c0_164] : memref<2x1x32xf32, #tpu.memory_space<vmem>>, vector<1x1x32xf32>
    %347 = vector.shape_cast %346 : vector<1x1x32xf32> to vector<1x32xf32>
    %cst_165 = arith.constant dense<0.000000e+00> : vector<16xf32>
    %348 = vector.multi_reduction <add>, %343, %cst_165 [1] : vector<16x32xf32> to vector<16xf32>
    %349 = vector.shape_cast %348 : vector<16xf32> to vector<16x1xf32>
    %cst_166 = arith.constant 3.200000e+01 : f32
    %350 = vector.broadcast %cst_166 : f32 to vector<16x1xf32>
    %351 = arith.divf %349, %350 : vector<16x1xf32>
    %352 = vector.broadcast %351 : vector<16x1xf32> to vector<16x32xf32>
    %353 = arith.subf %343, %352 : vector<16x32xf32>
    %354 = arith.mulf %353, %353 : vector<16x32xf32>
    %cst_167 = arith.constant dense<0.000000e+00> : vector<16xf32>
    %355 = vector.multi_reduction <add>, %354, %cst_167 [1] : vector<16x32xf32> to vector<16xf32>
    %356 = vector.shape_cast %355 : vector<16xf32> to vector<16x1xf32>
    %cst_168 = arith.constant 3.200000e+01 : f32
    %357 = vector.broadcast %cst_168 : f32 to vector<16x1xf32>
    %358 = arith.divf %356, %357 : vector<16x1xf32>
    %359 = vector.broadcast %351 : vector<16x1xf32> to vector<16x32xf32>
    %360 = arith.subf %343, %359 : vector<16x32xf32>
    %cst_169 = arith.constant 9.99999996E-13 : f32
    %361 = vector.broadcast %cst_169 : f32 to vector<16x1xf32>
    %362 = arith.addf %358, %361 : vector<16x1xf32>
    %363 = math.rsqrt %362 : vector<16x1xf32>
    %364 = vector.broadcast %363 : vector<16x1xf32> to vector<16x32xf32>
    %365 = arith.mulf %360, %364 : vector<16x32xf32>
    %366 = vector.broadcast %345 : vector<1x32xf32> to vector<16x32xf32>
    %367 = arith.mulf %365, %366 : vector<16x32xf32>
    %368 = vector.broadcast %347 : vector<1x32xf32> to vector<16x32xf32>
    %369 = arith.addf %367, %368 : vector<16x32xf32>
    %370 = vector.extract_strided_slice %369 {offsets = [0, 0], sizes = [1, 32], strides = [1, 1]} : vector<16x32xf32> to vector<1x32xf32>
    %c0_170 = arith.constant 0 : index
    %c0_171 = arith.constant 0 : index
    %371 = vector.load %arg17[%c0_170, %c0_171] : memref<32x16xf32, #tpu.memory_space<vmem>>, vector<32x16xf32>
    %cst_172 = arith.constant dense<0.000000e+00> : vector<1x16xf32>
    %372 = tpu.matmul %370, %371, %cst_172 {dimension_numbers = #tpu.dot_dimension_numbers<[1], [0], [0], [1], [0, 0, 1, 1], [], []>} : vector<1x32xf32>, vector<32x16xf32>, vector<1x16xf32> -> vector<1x16xf32>
    %c0_173 = arith.constant 0 : index
    %c0_174 = arith.constant 0 : index
    %373 = vector.load %arg18[%c0_173, %c0_174] : memref<1x16xf32, #tpu.memory_space<vmem>>, vector<1x16xf32>
    %374 = arith.addf %372, %373 : vector<1x16xf32>
    %c0_175 = arith.constant 0 : index
    %c0_176 = arith.constant 0 : index
    %375 = vector.load %arg19[%c0_175, %c0_176] : memref<2x16xf32, #tpu.memory_space<vmem>>, vector<1x16xf32>
    tpu.vector_store %arg19[%c0_175, %c0_176], %374 {strides = array<i32>} : memref<2x16xf32, #tpu.memory_space<vmem>>, vector<1x16xf32>,
    %376 = vector.extract_strided_slice %369 {offsets = [8, 0], sizes = [1, 32], strides = [1, 1]} : vector<16x32xf32> to vector<1x32xf32>
    %c0_177 = arith.constant 0 : index
    %c0_178 = arith.constant 0 : index
    %377 = vector.load %arg17[%c0_177, %c0_178] : memref<32x16xf32, #tpu.memory_space<vmem>>, vector<32x16xf32>
    %cst_179 = arith.constant dense<0.000000e+00> : vector<1x16xf32>
    %378 = tpu.matmul %376, %377, %cst_179 {dimension_numbers = #tpu.dot_dimension_numbers<[1], [0], [0], [1], [0, 0, 1, 1], [], []>} : vector<1x32xf32>, vector<32x16xf32>, vector<1x16xf32> -> vector<1x16xf32>
    %c0_180 = arith.constant 0 : index
    %c0_181 = arith.constant 0 : index
    %379 = vector.load %arg18[%c0_180, %c0_181] : memref<1x16xf32, #tpu.memory_space<vmem>>, vector<1x16xf32>
    %380 = arith.addf %378, %379 : vector<1x16xf32>
    %c1_182 = arith.constant 1 : index
    %c0_183 = arith.constant 0 : index
    %381 = vector.load %arg19[%c1_182, %c0_183] : memref<2x16xf32, #tpu.memory_space<vmem>>, vector<1x16xf32>
    tpu.vector_store %arg19[%c1_182, %c0_183], %380 {strides = array<i32>} : memref<2x16xf32, #tpu.memory_space<vmem>>, vector<1x16xf32>,
    return
  }
  func.func @transform_0(%arg0: i32) -> (i32, i32) {
    %c0_i32 = arith.constant 0 : i32
    %c0_i32_0 = arith.constant 0 : i32
    %c0_i32_1 = arith.constant 0 : i32
    return %c0_i32, %c0_i32_0 : i32, i32
  }
  func.func @transform_1(%arg0: i32) -> (i32, i32) {
    %c0_i32 = arith.constant 0 : i32
    %c0_i32_0 = arith.constant 0 : i32
    %c0_i32_1 = arith.constant 0 : i32
    return %c0_i32, %c0_i32_0 : i32, i32
  }
  func.func @transform_2(%arg0: i32) -> (i32, i32) {
    %c0_i32 = arith.constant 0 : i32
    %c0_i32_0 = arith.constant 0 : i32
    %c0_i32_1 = arith.constant 0 : i32
    return %c0_i32, %c0_i32_0 : i32, i32
  }
  func.func @transform_3(%arg0: i32) -> (i32, i32) {
    %c0_i32 = arith.constant 0 : i32
    %c0_i32_0 = arith.constant 0 : i32
    %c0_i32_1 = arith.constant 0 : i32
    return %c0_i32, %c0_i32_0 : i32, i32
  }
  func.func @transform_4(%arg0: i32) -> (i32, i32, i32) {
    %c0_i32 = arith.constant 0 : i32
    %c0_i32_0 = arith.constant 0 : i32
    %c0_i32_1 = arith.constant 0 : i32
    %c0_i32_2 = arith.constant 0 : i32
    return %c0_i32, %c0_i32_0, %c0_i32_1 : i32, i32, i32
  }
  func.func @transform_5(%arg0: i32) -> (i32, i32, i32) {
    %c0_i32 = arith.constant 0 : i32
    %c0_i32_0 = arith.constant 0 : i32
    %c0_i32_1 = arith.constant 0 : i32
    %c0_i32_2 = arith.constant 0 : i32
    return %c0_i32, %c0_i32_0, %c0_i32_1 : i32, i32, i32
  }
  func.func @transform_6(%arg0: i32) -> (i32, i32, i32) {
    %c0_i32 = arith.constant 0 : i32
    %c0_i32_0 = arith.constant 0 : i32
    %c0_i32_1 = arith.constant 0 : i32
    %c0_i32_2 = arith.constant 0 : i32
    return %c0_i32, %c0_i32_0, %c0_i32_1 : i32, i32, i32
  }
  func.func @transform_7(%arg0: i32) -> (i32, i32, i32) {
    %c0_i32 = arith.constant 0 : i32
    %c0_i32_0 = arith.constant 0 : i32
    %c0_i32_1 = arith.constant 0 : i32
    %c0_i32_2 = arith.constant 0 : i32
    return %c0_i32, %c0_i32_0, %c0_i32_1 : i32, i32, i32
  }
  func.func @transform_8(%arg0: i32) -> (i32, i32, i32) {
    %c0_i32 = arith.constant 0 : i32
    %c0_i32_0 = arith.constant 0 : i32
    %c0_i32_1 = arith.constant 0 : i32
    %c0_i32_2 = arith.constant 0 : i32
    return %c0_i32, %c0_i32_0, %c0_i32_1 : i32, i32, i32
  }
  func.func @transform_9(%arg0: i32) -> (i32, i32, i32) {
    %c0_i32 = arith.constant 0 : i32
    %c0_i32_0 = arith.constant 0 : i32
    %c0_i32_1 = arith.constant 0 : i32
    %c0_i32_2 = arith.constant 0 : i32
    return %c0_i32, %c0_i32_0, %c0_i32_1 : i32, i32, i32
  }
  func.func @transform_10(%arg0: i32) -> (i32, i32, i32) {
    %c0_i32 = arith.constant 0 : i32
    %c0_i32_0 = arith.constant 0 : i32
    %c0_i32_1 = arith.constant 0 : i32
    %c0_i32_2 = arith.constant 0 : i32
    return %c0_i32, %c0_i32_0, %c0_i32_1 : i32, i32, i32
  }
  func.func @transform_11(%arg0: i32) -> (i32, i32, i32) {
    %c0_i32 = arith.constant 0 : i32
    %c0_i32_0 = arith.constant 0 : i32
    %c0_i32_1 = arith.constant 0 : i32
    %c0_i32_2 = arith.constant 0 : i32
    return %c0_i32, %c0_i32_0, %c0_i32_1 : i32, i32, i32
  }
  func.func @transform_12(%arg0: i32) -> (i32, i32, i32) {
    %c0_i32 = arith.constant 0 : i32
    %c0_i32_0 = arith.constant 0 : i32
    %c0_i32_1 = arith.constant 0 : i32
    %c0_i32_2 = arith.constant 0 : i32
    return %c0_i32, %c0_i32_0, %c0_i32_1 : i32, i32, i32
  }
  func.func @transform_13(%arg0: i32) -> (i32, i32, i32) {
    %c0_i32 = arith.constant 0 : i32
    %c0_i32_0 = arith.constant 0 : i32
    %c0_i32_1 = arith.constant 0 : i32
    %c0_i32_2 = arith.constant 0 : i32
    return %c0_i32, %c0_i32_0, %c0_i32_1 : i32, i32, i32
  }
  func.func @transform_14(%arg0: i32) -> (i32, i32, i32) {
    %c0_i32 = arith.constant 0 : i32
    %c0_i32_0 = arith.constant 0 : i32
    %c0_i32_1 = arith.constant 0 : i32
    %c0_i32_2 = arith.constant 0 : i32
    return %c0_i32, %c0_i32_0, %c0_i32_1 : i32, i32, i32
  }
  func.func @transform_15(%arg0: i32) -> (i32, i32, i32) {
    %c0_i32 = arith.constant 0 : i32
    %c0_i32_0 = arith.constant 0 : i32
    %c0_i32_1 = arith.constant 0 : i32
    %c0_i32_2 = arith.constant 0 : i32
    return %c0_i32, %c0_i32_0, %c0_i32_1 : i32, i32, i32
  }
  func.func @transform_16(%arg0: i32) -> (i32, i32) {
    %c0_i32 = arith.constant 0 : i32
    %c0_i32_0 = arith.constant 0 : i32
    %c0_i32_1 = arith.constant 0 : i32
    return %c0_i32, %c0_i32_0 : i32, i32
  }
  func.func @transform_17(%arg0: i32) -> (i32, i32) {
    %c0_i32 = arith.constant 0 : i32
    %c0_i32_0 = arith.constant 0 : i32
    %c0_i32_1 = arith.constant 0 : i32
    return %c0_i32, %c0_i32_0 : i32, i32
  }
  func.func @transform_18(%arg0: i32) -> (i32, i32) {
    %c0_i32 = arith.constant 0 : i32
    %c0_i32_0 = arith.constant 0 : i32
    %c0_i32_1 = arith.constant 0 : i32
    return %c0_i32, %c0_i32_0 : i32, i32
  }
}

</mosaic_0001>

<bundles_post_ra>
// kernel: encoder_forward.1
= control target key start
LH: loop header
LB: loop body
LE: loop exit
PB: predicated region body
PF: predicated region fallthrough
CT: control target
= control target key end

     0   :  { %s2025_s0 = inlined_call_operand.vmem [shape: f32[16,32], index: 0, kind: input, shape index: {}]   ;;  %s2026_s1 = inlined_call_operand.vmem [shape: f32[2,8], index: 1, kind: input, shape index: {}]   ;;  %s2027_s2 = inlined_call_operand.vmem [shape: f32[1,32], index: 2, kind: input, shape index: {}]   ;;  %s2028_s3 = inlined_call_operand.vmem [shape: f32[1,32], index: 3, kind: input, shape index: {}]   ;;  %s2029_s4 = inlined_call_operand.vmem [shape: f32[2,32,96], index: 4, kind: input, shape index: {}]   ;;  %s2030_s5 = inlined_call_operand.vmem [shape: f32[2,1,96], index: 5, kind: input, shape index: {}]   ;;  %s2031_s6 = inlined_call_operand.vmem [shape: f32[2,32,32], index: 6, kind: input, shape index: {}]   ;;  %s2032_s7 = inlined_call_operand.vmem [shape: f32[2,1,32], index: 7, kind: input, shape index: {}]   ;;  %s2033_s8 = inlined_call_operand.vmem [shape: f32[2,1,32], index: 8, kind: input, shape index: {}]   ;;  %s2034_s9 = inlined_call_operand.vmem [shape: f32[2,1,32], index: 9, kind: input, shape index: {}]   ;;  %s2035_s10 = inlined_call_operand.vmem [shape: f32[2,32,64], index: 10, kind: input, shape index: {}]   ;;  %s2036_s11 = inlined_call_operand.vmem [shape: f32[2,1,64], index: 11, kind: input, shape index: {}]   ;;  %s2037_s12 = inlined_call_operand.vmem [shape: f32[2,64,32], index: 12, kind: input, shape index: {}]   ;;  %s2038_s13 = inlined_call_operand.vmem [shape: f32[2,1,32], index: 13, kind: input, shape index: {}]   ;;  %s2039_s14 = inlined_call_operand.vmem [shape: f32[2,1,32], index: 14, kind: input, shape index: {}]   ;;  %s2040_s15 = inlined_call_operand.vmem [shape: f32[2,1,32], index: 15, kind: input, shape index: {}]   ;;  %s2041_s16 = inlined_call_operand.vmem [shape: f32[32,16], index: 16, kind: input, shape index: {}]   ;;  %s2042_s17 = inlined_call_operand.vmem [shape: f32[1,16], index: 17, kind: input, shape index: {}]   ;;  %s2043_s18 = inlined_call_operand.hbm [shape: f32[2,16], index: 18, kind: output, shape index: {}]  }
   0x1   :  { %2045 = sst [smem:[#allocation6_spill]] %s2025_s0 }
   0x2   :  { %2046 = sst [smem:[#allocation7_spill]] %s2026_s1 }
   0x3   :  { %2047 = sst [smem:[#allocation8_spill]] %s2027_s2 }
   0x4   :  { %s2048_s29 = sld [smem:[#allocation6_spill]]  ;;  %vm64_vm0 = vcmask 261120  }
   0xa   :  { %v60_v0 = vld [vmem:[%s2048_s29] sm:$0xff]  ;;  %v61_v1 = vld [vmem:[%s2048_s29 + $0x8] sm:$0xff] }
   0xb   :  { %v65_v2 = vsel %vm64_vm0, %v60_v0, 0.0  ;;  %v68_v3 = vsel %vm64_vm0, %v61_v1, 0.0 }
   0xc   :  { %66 = vadd.xlane.f32.xlu0 %v65_v2  ;;  %69 = vadd.xlane.f32.xlu1 %v68_v3 }
   0xd   :  { %23 = vsyncpa [#allocation4], 0  ;;  %v1522_v4 = vmov 32.0   ;;  %v132_v21 = vld [vmem:[%s2029_s4 + $0x18] sm:$0xff]  ;;  %v131_v22 = vld [vmem:[%s2029_s4 + $0x10] sm:$0xff]  ;;  %s2049_s27 = sld [smem:[#allocation8_spill]] }
   0xe   :  { %1434 = vrcp.f32 %v1522_v4  ;;  %155 = vmatpush.msra.mxu0 %v132_v21  ;;  %v130_v23 = vld [vmem:[%s2029_s4 + $0x8] sm:$0xff]  ;;  %v129_v24 = vld [vmem:[%s2029_s4] sm:$0xff]  ;;  %s1524_s19 = smov 96   ;;  %s1525_s1 = smov 80   ;;  %vm170_vm8 = vcmask 130048   ;;  %vm195_vm9 = vcmask 64512  }
   0xf   :  { %v1417_v46 = vld [vmem:[%s2028_s3] ss:$0 sm:$0xff]  ;;  %s1523_s3 = smov 112   ;;  %s2050_s22 = sld [smem:[#allocation7_spill]]  ;;  %vm303_vm10 = vcmask 261248   ;;  %vm605_vm14 = vcmask 523264  }
  0x10   :  { %156 = vmatpush.msra.mxu0 %v131_v22  ;;  %v1418_v53 = vld [vmem:[%s2030_s5] ss:$0 sm:$0xff]  ;;  %s1526_s2 = smov 64   ;;  %s1527_s23 = smov 48  }
  0x11   :  { %s1528_s24 = smov 16   ;;  %s1529_s30 = smov [#allocation3]  }
  0x12   :  { %157 = vmatpush.msra.mxu0 %v130_v23  ;;  %s1327_s0 = sshll.u32 %s1529_s30, 4  ;;  %s1328_s0 = int_to_ptr.vmem [resolvable:$true] %s1327_s0 }
  0x13   :  { %v1416_v42 = vld [vmem:[%s2049_s27] ss:$0 sm:$0xff] }
  0x14   :  { %v1435_v5 = vpop.eup %1434  ;;  %158 = vmatpush.msra.mxu0 %v129_v24 }
  0x15   :  { %v72_v6 = vmul.f32 32.0, %v1435_v5  ;;  %vm76_vm1 = vweird.f32 %v1435_v5  ;;  %v126_v59 = vld [vmem:[%s2050_s22] sm:$0x3] }
  0x16   :  { %v127_v60 = vsub.f32 1.0, %v126_v59 }
  0x17   :  { %v73_v7 = vsub.f32 1.0, %v72_v6 }
  0x18   :  { %v128_v62 = vmul.f32 -1e+09, %v127_v60 }
  0x19   :  { %v74_v8 = vmul.f32 %v1435_v5, %v73_v7 }
  0x1a   :  { %v1680_v63 = vperm.slane %v128_v62, 0 }
  0x1b   :  { %v75_v9 = vadd.f32 %v1435_v5, %v74_v8 }
  0x1d   :  { %v1633_v10 = vsel %vm76_vm1, %v1435_v5, %v75_v9 }
  0x7f   :  { %v67_v11 = vpop.xlane.xlu0 %66  ;;  %v70_v12 = vpop.xlane.xlu1 %69 }
  0x80   :  { %v78_v13 = vmul.f32 %v1633_v10, %v67_v11  ;;  %v79_v14 = vmul.f32 %v1633_v10, %v70_v12 }
  0x82   :  { %v80_v15 = vsub.f32 %v60_v0, %v78_v13  ;;  %v81_v16 = vsub.f32 %v61_v1, %v79_v14 }
  0x84   :  { %v82_v17 = vmul.f32 %v80_v15, %v80_v15  ;;  %v83_v18 = vmul.f32 %v81_v16, %v81_v16 }
  0x86   :  { %v84_v19 = vsel %vm64_vm0, %v82_v17, 0.0  ;;  %v87_v20 = vsel %vm64_vm0, %v83_v18, 0.0 }
  0x87   :  { %85 = vadd.xlane.f32.xlu0 %v84_v19  ;;  %88 = vadd.xlane.f32.xlu1 %v87_v20 }
  0xfa   :  { %v86_v25 = vpop.xlane.xlu0 %85  ;;  %v89_v26 = vpop.xlane.xlu1 %88 }
  0xfb   :  { %v90_v27 = vmul.f32 %v86_v25, %v1633_v10  ;;  %v91_v28 = vmul.f32 %v89_v26, %v1633_v10  ;;  %v1703_v25 = vperm.slane %v128_v62, 1  ;;  %v1738_v62 = vld [vmem:[%s2032_s7] ss:$0 sm:$0xff] }
  0xfd   :  { %v92_v29 = vadd.f32 1e-12, %v90_v27  ;;  %v93_v30 = vadd.f32 1e-12, %v91_v28 }
  0xff   :  { %1436 = vrsqrt.f32 %v92_v29  ;;  %vm110_vm2 = vweird.f32 %v93_v30  ;;  %vm100_vm5 = vweird.f32 %v92_v29 }
 0x100   :  { %1438 = vrsqrt.f32 %v93_v30 }
 0x105   :  { %v1437_v31 = vpop.eup %1436 }
 0x106   :  { %v1439_v32 = vpop.eup %1438  ;;  %v95_v33 = vmul.f32 %v1437_v31, %v92_v29  ;;  %vm101_vm4 = vweird.f32 %v1437_v31 }
 0x107   :  { %v105_v34 = vmul.f32 %v1439_v32, %v93_v30  ;;  %vm111_vm3 = vweird.f32 %v1439_v32  ;;  %vm102_vm7 = vmor %vm100_vm5, %vm101_vm4 }
 0x108   :  { %v96_v35 = vmul.f32 %v1437_v31, %v95_v33  ;;  %vm112_vm6 = vmor %vm110_vm2, %vm111_vm3 }
 0x109   :  { %v106_v36 = vmul.f32 %v1439_v32, %v105_v34 }
 0x10a   :  { %v97_v37 = vmul.f32 0.5, %v96_v35 }
 0x10b   :  { %v107_v38 = vmul.f32 0.5, %v106_v36 }
 0x10c   :  { %v98_v39 = vsub.f32 1.5, %v97_v37 }
 0x10d   :  { %v108_v40 = vsub.f32 1.5, %v107_v38 }
 0x10e   :  { %v99_v41 = vmul.f32 %v1437_v31, %v98_v39 }
 0x10f   :  { %v109_v43 = vmul.f32 %v1439_v32, %v108_v40 }
 0x110   :  { %v103_v44 = vsel %vm102_vm7, %v1437_v31, %v99_v41 }
 0x111   :  { %v114_v45 = vmul.f32 %v103_v44, %v80_v15  ;;  %v113_v47 = vsel %vm112_vm6, %v1439_v32, %v109_v43  ;;  %v446_v44 = vld [vmem:[%s2031_s6 + $0x18] sm:$0xff] }
 0x112   :  { %v115_v49 = vmul.f32 %v113_v47, %v81_v16  ;;  %v443_v47 = vld [vmem:[%s2031_s6] sm:$0xff] }
 0x113   :  { %v119_v48 = vmul.f32 %v1416_v42, %v114_v45  ;;  %v445_v45 = vld [vmem:[%s2031_s6 + $0x10] sm:$0xff] }
 0x114   :  { %v120_v51 = vmul.f32 %v1416_v42, %v115_v49 }
 0x115   :  { %v1659_v50 = vadd.f32 %v1417_v46, %v119_v48 }
 0x116   :  { %v1663_v52 = vadd.f32 %v1417_v46, %v120_v51  ;;  %v444_v46 = vld [vmem:[%s2031_s6 + $0x8] sm:$0xff] }
 0x117   :  { %1338 = vmatmul.msk.f32.vlgmr.msra.gmra.mxu0 %vm64_vm0, %v1659_v50 }
 0x11f   :  { %1339 = vmatmul.msk.f32.gmra.mxu0 %vm64_vm0, %v1663_v52 }
 0x194   :  { %v160_v54 = vpop.f32.mrf.mxu0 }
 0x195   :  { %v161_v55 = vadd.f32 %v1418_v53, %v160_v54 }
 0x197   :  { %234 = vrot.lane.b32.xlu0 %v161_v55, %s1523_s3  ;;  %168 = vrot.lane.b32.xlu2 %v161_v55, %s1524_s19 }
 0x19c   :  { %v163_v61 = vpop.f32.mrf.mxu0 }
 0x19d   :  { %v1684_v3 = vadd.f32 %v1418_v53, %v163_v61 }
 0x19f   :  { %236 = vrot.lane.b32.xlu2 %v161_v55, %s1525_s1 }
 0x1f1   :  { %v169_v56 = vpop.permute.xlu2 %168 }
 0x1f2   :  { %1340 = vmatpush.xpose.msk.msrb.mxu0 %vm170_vm8, %v169_v56 }
 0x1f5   :  { %1341 = vmatmul.msk.f32.vlgmr.msrb.gmra.mxu0 %vm170_vm8, %v161_v55 }
 0x1f9   :  { %v237_v57 = vpop.permute.xlu2 %236 }
 0x1fa   :  { %1343 = vmatpush.xpose.msk.msra.mxu3 %vm170_vm8, %v237_v57 }
 0x209   :  { %v235_v58 = vpop.permute.xlu0 %234 }
 0x20a   :  { %1344 = vmatmul.msk.f32.vlgmr.msra.gmra.mxu3 %vm170_vm8, %v235_v58 }
 0x272   :  { %v192_v0 = vpop.f32.mrf.mxu0 }
 0x273   :  { %v193_v1 = vadd.f32 %v192_v0, %v1680_v63 }
 0x275   :  { %v196_v2 = vsel %vm195_vm9, %v193_v1, -inf }
 0x276   :  { %197 = vmax.xlane.f32.xlu1 %v196_v2 }
 0x28d   :  { %v259_v4 = vpop.f32.mrf.mxu3 }
 0x28e   :  { %v260_v5 = vadd.f32 %v259_v4, %v1680_v63 }
 0x28f   :  { %307 = vrot.lane.b32.xlu1 %v1684_v3, %s1524_s19 }
 0x290   :  { %v262_v6 = vsel %vm195_vm9, %v260_v5, -inf }
 0x291   :  { %263 = vmax.xlane.f32.xlu2 %v262_v6 }
 0x2a9   :  { %207 = vrot.lane.b32.xlu2 %v161_v55, %s1526_s2 }
 0x2b1   :  { %373 = vrot.lane.b32.xlu2 %v1684_v3, %s1525_s1 }
 0x2b9   :  { %371 = vrot.lane.b32.xlu2 %v1684_v3, %s1523_s3 }
 0x2e9   :  { %v198_v7 = vpop.xlane.xlu1 %197 }
 0x2ea   :  { %v199_v8 = vsub.f32 %v193_v1, %v198_v7 }
 0x2ec   :  { %v200_v9 = vmul.f32 1.442695, %v199_v8 }
 0x2ee   :  { %1440 = vpow2.f32 %v200_v9 }
 0x2f4   :  { %v1441_v11 = vpop.eup %1440 }
 0x2f5   :  { %v202_v12 = vsel %vm195_vm9, %v1441_v11, 0.0 }
 0x2f6   :  { %203 = vadd.xlane.f32.xlu0 %v202_v12 }
 0x301   :  { %v308_v13 = vpop.permute.xlu1 %307 }
 0x302   :  { %1346 = vmatpush.xpose.msk.msra.mxu1 %vm170_vm8, %v308_v13 }
 0x304   :  { %v264_v14 = vpop.xlane.xlu2 %263 }
 0x305   :  { %v265_v15 = vsub.f32 %v260_v5, %v264_v14  ;;  %1347 = vmatmul.msk.f32.vlgmr.msra.gmra.mxu1 %vm170_vm8, %v1684_v3  ;;  %v540_v14 = vld [vmem:[%s2035_s10 + $0x10] sm:$0xff] }
 0x307   :  { %v266_v16 = vmul.f32 1.442695, %v265_v15  ;;  %v539_v15 = vld [vmem:[%s2035_s10 + $0x8] sm:$0xff] }
 0x309   :  { %1442 = vpow2.f32 %v266_v16  ;;  %v538_v16 = vld [vmem:[%s2035_s10] sm:$0xff] }
 0x30a   :  { %273 = vrot.lane.b32.xlu0 %v161_v55, %s1527_s23 }
 0x30c   :  { %v208_v17 = vpop.permute.xlu2 %207 }
 0x30d   :  { %228 = vmatpush.msra.mxu2 %v208_v17 }
 0x30f   :  { %v1443_v18 = vpop.eup %1442 }
 0x310   :  { %v268_v19 = vsel %vm195_vm9, %v1443_v18, 0.0 }
 0x311   :  { %269 = vadd.xlane.f32.xlu1 %v268_v19 }
 0x314   :  { %v374_v24 = vpop.permute.xlu2 %373 }
 0x31c   :  { %v372_v32 = vpop.permute.xlu2 %371 }
 0x369   :  { %v204_v20 = vpop.xlane.xlu0 %203 }
 0x36a   :  { %1444 = vrcp.f32 %v204_v20 }
 0x370   :  { %v1445_v21 = vpop.eup %1444 }
 0x371   :  { %v206_v22 = vmul.f32 %v1445_v21, %v1441_v11 }
 0x373   :  { %1342 = vmatmul.msk.f32.vlgmr.msra.gmra.mxu2 %vm195_vm9, %v206_v22 }
 0x37c   :  { %v274_v23 = vpop.permute.xlu0 %273 }
 0x37d   :  { %294 = vmatpush.msrb.mxu2 %v274_v23 }
 0x37f   :  { %1349 = vmatpush.xpose.msk.msra.mxu2 %vm170_vm8, %v374_v24 }
 0x382   :  { %v330_v26 = vpop.f32.mrf.mxu1 }
 0x383   :  { %v331_v27 = vadd.f32 %v330_v26, %v1703_v25 }
 0x384   :  { %v270_v28 = vpop.xlane.xlu1 %269 }
 0x385   :  { %1446 = vrcp.f32 %v270_v28  ;;  %v333_v29 = vsel %vm195_vm9, %v331_v27, -inf }
 0x386   :  { %334 = vmax.xlane.f32.xlu1 %v333_v29  ;;  %v1765_v29 = vld [vmem:[%s2033_s8] ss:$0 sm:$0xff] }
 0x38b   :  { %v1447_v30 = vpop.eup %1446 }
 0x38c   :  { %v272_v31 = vmul.f32 %v1447_v30, %v1443_v18 }
 0x38e   :  { %1345 = vmatmul.msk.f32.vlgmr.msrb.gmra.mxu2 %vm195_vm9, %v272_v31 }
 0x396   :  { %1350 = vmatmul.msk.f32.vlgmr.msra.gmra.mxu2 %vm170_vm8, %v372_v32  ;;  %v1770_v32 = vld [vmem:[%s2034_s9] ss:$0 sm:$0xff] }
 0x39f   :  { %344 = vrot.lane.b32.xlu1 %v1684_v3, %s1526_s2 }
 0x3f6   :  { %v230_v33 = vpop.f32.mrf.mxu2 }
 0x3f7   :  { %233 = vst.msk [vmem:[#allocation2] sm:$0xff] %vm170_vm8, %v230_v33 }
 0x3f9   :  { %v335_v34 = vpop.xlane.xlu1 %334 }
 0x3fa   :  { %v336_v35 = vsub.f32 %v331_v27, %v335_v34 }
 0x3fc   :  { %v337_v36 = vmul.f32 1.442695, %v336_v35  ;;  %v600_v35 = vld [vmem:[%s2037_s12 + $0x38] sm:$0xff] }
 0x3fd   :  { %620 = vmatpush.msrb.mxu2 %v600_v35 }
 0x3fe   :  { %1448 = vpow2.f32 %v337_v36  ;;  %v599_v36 = vld [vmem:[%s2037_s12 + $0x30] sm:$0xff] }
 0x3ff   :  { %621 = vmatpush.msrb.mxu2 %v599_v36 }
 0x404   :  { %v1449_v37 = vpop.eup %1448 }
 0x405   :  { %v339_v38 = vsel %vm195_vm9, %v1449_v37, 0.0 }
 0x406   :  { %340 = vadd.xlane.f32.xlu0 %v339_v38  ;;  %v597_v38 = vld [vmem:[%s2037_s12 + $0x20] sm:$0xff] }
 0x411   :  { %v345_v39 = vpop.permute.xlu1 %344  ;;  %v296_v40 = vpop.f32.mrf.mxu2 }
 0x412   :  { %365 = vmatpush.msrb.mxu3 %v345_v39  ;;  %300 = vrot.lane.b32.xlu1 %v296_v40, %s1528_s24  ;;  %v596_v39 = vld [vmem:[%s2037_s12 + $0x18] sm:$0xff]  ;;  %v595_v40 = vld [vmem:[%s2037_s12 + $0x10] sm:$0xff] }
 0x414   :  { %469 = vmatpush.msra.mxu3 %v446_v44 }
 0x416   :  { %470 = vmatpush.msra.mxu3 %v445_v45 }
 0x418   :  { %471 = vmatpush.msra.mxu3 %v444_v46 }
 0x419   :  { %v396_v41 = vpop.f32.mrf.mxu2 }
 0x41a   :  { %v397_v42 = vadd.f32 %v396_v41, %v1703_v25  ;;  %472 = vmatpush.msra.mxu3 %v443_v47  ;;  %v594_v41 = vld [vmem:[%s2037_s12 + $0x8] sm:$0xff]  ;;  %v1422_v47 = vld [vmem:[%s2036_s11] ss:$0 sm:$0xff] }
 0x41c   :  { %v399_v43 = vsel %vm195_vm9, %v397_v42, -inf }
 0x41d   :  { %400 = vmax.xlane.f32.xlu2 %v399_v43  ;;  %v593_v43 = vld [vmem:[%s2037_s12] sm:$0xff] }
 0x435   :  { %410 = vrot.lane.b32.xlu2 %v1684_v3, %s1527_s23 }
 0x479   :  { %v341_v48 = vpop.xlane.xlu0 %340 }
 0x47a   :  { %1450 = vrcp.f32 %v341_v48 }
 0x480   :  { %v1451_v49 = vpop.eup %1450 }
 0x481   :  { %v343_v51 = vmul.f32 %v1451_v49, %v1449_v37  ;;  %v598_v37 = vld [vmem:[%s2037_s12 + $0x28] sm:$0xff] }
 0x482   :  { %622 = vmatpush.msrb.mxu2 %v598_v37 }
 0x483   :  { %1348 = vmatmul.msk.f32.vlgmr.msrb.gmra.mxu3 %vm195_vm9, %v343_v51 }
 0x484   :  { %v301_v53 = vpop.permute.xlu1 %300  ;;  %623 = vmatpush.msrb.mxu2 %v597_v38 }
 0x485   :  { %304 = vst.msk [vmem:[#allocation2] sm:$0xff] %vm303_vm10, %v301_v53 }
 0x486   :  { %624 = vmatpush.msrb.mxu2 %v596_v39 }
 0x488   :  { %625 = vmatpush.msrb.mxu2 %v595_v40 }
 0x48a   :  { %626 = vmatpush.msrb.mxu2 %v594_v41 }
 0x48c   :  { %v441_v54 = vld [vmem:[#allocation2] sm:$0xff]  ;;  %627 = vmatpush.msrb.mxu2 %v593_v43 }
 0x48d   :  { %1352 = vmatmul.msk.f32.vlgmr.msra.gmra.mxu3 %vm64_vm0, %v441_v54 }
 0x490   :  { %v401_v55 = vpop.xlane.xlu2 %400 }
 0x491   :  { %v402_v56 = vsub.f32 %v397_v42, %v401_v55 }
 0x493   :  { %v403_v57 = vmul.f32 1.442695, %v402_v56 }
 0x495   :  { %1452 = vpow2.f32 %v403_v57 }
 0x498   :  { %v411_v58 = vpop.permute.xlu2 %410 }
 0x499   :  { %431 = vmatpush.msrb.mxu1 %v411_v58 }
 0x49b   :  { %v1453_v59 = vpop.eup %1452 }
 0x49c   :  { %v405_v60 = vsel %vm195_vm9, %v1453_v59, 0.0 }
 0x49d   :  { %406 = vadd.xlane.f32.xlu1 %v405_v60 }
 0x506   :  { %v367_v61 = vpop.f32.mrf.mxu3 }
 0x507   :  { %370 = vst.msk [vmem:[#allocation2 + $0x8] sm:$0xff] %vm170_vm8, %v367_v61 }
 0x510   :  { %v474_v0 = vpop.f32.mrf.mxu3  ;;  %v407_v1 = vpop.xlane.xlu1 %406 }
 0x511   :  { %v475_v2 = vadd.f32 %v1738_v62, %v474_v0  ;;  %1454 = vrcp.f32 %v407_v1 }
 0x513   :  { %v480_v3 = vadd.f32 %v475_v2, %v1659_v50  ;;  %v541_v50 = vld [vmem:[%s2035_s10 + $0x18] sm:$0xff]  ;;  %v1811_v2 = vld [vmem:[%s2038_s13] ss:$0 sm:$0xff] }
 0x514   :  { %564 = vmatpush.msra.mxu0 %v541_v50 }
 0x515   :  { %v484_v4 = vsel %vm64_vm0, %v480_v3, 0.0 }
 0x516   :  { %485 = vadd.xlane.f32.xlu0 %v484_v4  ;;  %565 = vmatpush.msra.mxu0 %v540_v14 }
 0x517   :  { %v1455_v5 = vpop.eup %1454 }
 0x518   :  { %v409_v6 = vmul.f32 %v1455_v5, %v1453_v59  ;;  %566 = vmatpush.msra.mxu0 %v539_v15 }
 0x51a   :  { %1351 = vmatmul.msk.f32.vlgmr.msrb.gmra.mxu1 %vm195_vm9, %v409_v6  ;;  %567 = vmatpush.msra.mxu0 %v538_v16 }
 0x589   :  { %v486_v7 = vpop.xlane.xlu0 %485 }
 0x58a   :  { %v490_v8 = vmul.f32 %v486_v7, %v1633_v10 }
 0x58c   :  { %v492_v9 = vsub.f32 %v480_v3, %v490_v8 }
 0x58e   :  { %v494_v11 = vmul.f32 %v492_v9, %v492_v9 }
 0x590   :  { %v496_v12 = vsel %vm64_vm0, %v494_v11, 0.0 }
 0x591   :  { %497 = vadd.xlane.f32.xlu2 %v496_v12 }
 0x597   :  { %v433_v13 = vpop.f32.mrf.mxu1 }
 0x598   :  { %437 = vrot.lane.b32.xlu0 %v433_v13, %s1528_s24 }
 0x604   :  { %v498_v17 = vpop.xlane.xlu2 %497 }
 0x605   :  { %v502_v18 = vmul.f32 %v498_v17, %v1633_v10 }
 0x607   :  { %v504_v19 = vadd.f32 1e-12, %v502_v18 }
 0x609   :  { %1456 = vrsqrt.f32 %v504_v19  ;;  %vm512_vm12 = vweird.f32 %v504_v19 }
 0x60a   :  { %v438_v20 = vpop.permute.xlu0 %437 }
 0x60b   :  { %440 = vst.msk [vmem:[#allocation2 + $0x8] sm:$0xff] %vm303_vm10, %v438_v20 }
 0x60f   :  { %v1457_v21 = vpop.eup %1456 }
 0x610   :  { %v507_v22 = vmul.f32 %v1457_v21, %v504_v19  ;;  %vm513_vm11 = vweird.f32 %v1457_v21 }
 0x611   :  { %vm514_vm13 = vmor %vm512_vm12, %vm513_vm11 }
 0x612   :  { %v508_v23 = vmul.f32 %v1457_v21, %v507_v22  ;;  %v442_v24 = vld [vmem:[#allocation2 + $0x8] sm:$0xff] }
 0x613   :  { %1353 = vmatmul.msk.f32.gmra.mxu3 %vm64_vm0, %v442_v24 }
 0x614   :  { %v509_v26 = vmul.f32 0.5, %v508_v23 }
 0x616   :  { %v510_v27 = vsub.f32 1.5, %v509_v26 }
 0x618   :  { %v511_v28 = vmul.f32 %v1457_v21, %v510_v27  ;;  %v1361_v27 = vld [vmem:[%s2029_s4 + $0x38] sm:$0xff] }
 0x619   :  { %721 = vmatpush.msra.mxu1 %v1361_v27 }
 0x61a   :  { %v515_v30 = vsel %vm514_vm13, %v1457_v21, %v511_v28 }
 0x61b   :  { %v526_v31 = vmul.f32 %v515_v30, %v492_v9 }
 0x61d   :  { %v531_v33 = vmul.f32 %v1765_v29, %v526_v31  ;;  %v1359_v31 = vld [vmem:[%s2029_s4 + $0x28] sm:$0xff] }
 0x61f   :  { %v536_v34 = vadd.f32 %v1770_v32, %v531_v33 }
 0x621   :  { %1354 = vmatmul.msk.f32.vlgmr.msra.gmra.mxu0 %vm64_vm0, %v536_v34 }
 0x696   :  { %v477_v42 = vpop.f32.mrf.mxu3 }
 0x697   :  { %v478_v44 = vadd.f32 %v1738_v62, %v477_v42 }
 0x699   :  { %v481_v45 = vadd.f32 %v478_v44, %v1663_v52 }
 0x69b   :  { %v487_v46 = vsel %vm64_vm0, %v481_v45, 0.0 }
 0x69c   :  { %488 = vadd.xlane.f32.xlu0 %v487_v46 }
 0x69e   :  { %v569_v48 = vpop.f32.mrf.mxu0 }
 0x69f   :  { %v570_v49 = vadd.f32 %v1422_v47, %v569_v48 }
 0x6a1   :  { %v575_v51 = vmul.f32 %v570_v49, %v570_v49 }
 0x6a3   :  { %v577_v53 = vmul.f32 %v575_v51, %v570_v49  ;;  %v1424_v51 = vld [vmem:[%s2039_s14] ss:$0 sm:$0xff] }
 0x6a5   :  { %v579_v54 = vmul.f32 0.044715, %v577_v53 }
 0x6a7   :  { %v581_v55 = vadd.f32 %v579_v54, %v570_v49 }
 0x6a9   :  { %v583_v56 = vmul.f32 0.7978846, %v581_v55  ;;  %v1425_v55 = vld [vmem:[%s2040_s15] ss:$0 sm:$0xff] }
 0x6ab   :  { %1458 = vtanh.f32 %v583_v56 }
 0x6b1   :  { %v1459_v57 = vpop.eup %1458 }
 0x6b2   :  { %v587_v58 = vadd.f32 1.0, %v1459_v57 }
 0x6b4   :  { %v589_v59 = vmul.f32 0.5, %v587_v58 }
 0x6b6   :  { %v591_v52 = vmul.f32 %v589_v59, %v570_v49 }
 0x6b8   :  { %1356 = vmatmul.msk.f32.vlgmr.msrb.gmra.mxu2 %vm605_vm14, %v591_v52 }
 0x70f   :  { %v489_v60 = vpop.xlane.xlu0 %488 }
 0x710   :  { %v491_v61 = vmul.f32 %v489_v60, %v1633_v10 }
 0x712   :  { %v493_v62 = vsub.f32 %v481_v45, %v491_v61  ;;  %v1426_v61 = vld [vmem:[%s2030_s5 + $0x1] ss:$0 sm:$0xff] }
 0x714   :  { %v495_v0 = vmul.f32 %v493_v62, %v493_v62 }
 0x716   :  { %v499_v1 = vsel %vm64_vm0, %v495_v0, 0.0 }
 0x717   :  { %500 = vadd.xlane.f32.xlu1 %v499_v1 }
 0x73b   :  { %v629_v3 = vpop.f32.mrf.mxu2 }
 0x73c   :  { %v630_v4 = vadd.f32 %v1811_v2, %v629_v3 }
 0x73e   :  { %v635_v5 = vadd.f32 %v630_v4, %v536_v34 }
 0x740   :  { %v639_v6 = vsel %vm64_vm0, %v635_v5, 0.0 }
 0x741   :  { %640 = vadd.xlane.f32.xlu1 %v639_v6 }
 0x78a   :  { %v501_v7 = vpop.xlane.xlu1 %500 }
 0x78b   :  { %v503_v8 = vmul.f32 %v501_v7, %v1633_v10 }
 0x78d   :  { %v505_v9 = vadd.f32 1e-12, %v503_v8 }
 0x78f   :  { %1460 = vrsqrt.f32 %v505_v9  ;;  %vm522_vm1 = vweird.f32 %v505_v9 }
 0x795   :  { %v1461_v11 = vpop.eup %1460 }
 0x796   :  { %v517_v12 = vmul.f32 %v1461_v11, %v505_v9  ;;  %vm523_vm15 = vweird.f32 %v1461_v11 }
 0x797   :  { %vm524_vm2 = vmor %vm522_vm1, %vm523_vm15 }
 0x798   :  { %v518_v13 = vmul.f32 %v1461_v11, %v517_v12 }
 0x79a   :  { %v519_v50 = vmul.f32 0.5, %v518_v13 }
 0x79c   :  { %v520_v14 = vsub.f32 1.5, %v519_v50 }
 0x79e   :  { %v521_v15 = vmul.f32 %v1461_v11, %v520_v14 }
 0x7a0   :  { %v525_v16 = vsel %vm524_vm2, %v1461_v11, %v521_v15 }
 0x7a1   :  { %v527_v17 = vmul.f32 %v525_v16, %v493_v62 }
 0x7a3   :  { %v532_v18 = vmul.f32 %v1765_v29, %v527_v17  ;;  %v1360_v29 = vld [vmem:[%s2029_s4 + $0x30] sm:$0xff] }
 0x7a4   :  { %722 = vmatpush.msra.mxu1 %v1360_v29 }
 0x7a5   :  { %v537_v19 = vadd.f32 %v1770_v32, %v532_v18  ;;  %v1358_v32 = vld [vmem:[%s2029_s4 + $0x20] sm:$0xff] }
 0x7a6   :  { %723 = vmatpush.msra.mxu1 %v1359_v31 }
 0x7a7   :  { %1355 = vmatmul.msk.f32.gmra.mxu0 %vm64_vm0, %v537_v19 }
 0x7a8   :  { %724 = vmatpush.msra.mxu1 %v1358_v32 }
 0x7b4   :  { %v641_v20 = vpop.xlane.xlu1 %640 }
 0x7b5   :  { %v645_v21 = vmul.f32 %v641_v20, %v1633_v10 }
 0x7b7   :  { %v647_v22 = vsub.f32 %v635_v5, %v645_v21 }
 0x7b9   :  { %v649_v23 = vmul.f32 %v647_v22, %v647_v22 }
 0x7bb   :  { %v651_v24 = vsel %vm64_vm0, %v649_v23, 0.0 }
 0x7bc   :  { %652 = vadd.xlane.f32.xlu1 %v651_v24 }
 0x824   :  { %v572_v26 = vpop.f32.mrf.mxu0 }
 0x825   :  { %v573_v28 = vadd.f32 %v1422_v47, %v572_v26 }
 0x827   :  { %v576_v30 = vmul.f32 %v573_v28, %v573_v28 }
 0x829   :  { %v578_v33 = vmul.f32 %v576_v30, %v573_v28 }
 0x82b   :  { %v580_v34 = vmul.f32 0.044715, %v578_v33 }
 0x82d   :  { %v582_v35 = vadd.f32 %v580_v34, %v573_v28 }
 0x82f   :  { %v653_v36 = vpop.xlane.xlu1 %652  ;;  %v584_v37 = vmul.f32 0.7978846, %v582_v35 }
 0x830   :  { %v657_v38 = vmul.f32 %v653_v36, %v1633_v10 }
 0x831   :  { %1462 = vtanh.f32 %v584_v37 }
 0x832   :  { %v659_v39 = vadd.f32 1e-12, %v657_v38 }
 0x834   :  { %1464 = vrsqrt.f32 %v659_v39  ;;  %vm667_vm4 = vweird.f32 %v659_v39 }
 0x837   :  { %v1463_v40 = vpop.eup %1462 }
 0x838   :  { %v588_v41 = vadd.f32 1.0, %v1463_v40 }
 0x83a   :  { %v1465_v42 = vpop.eup %1464  ;;  %v590_v43 = vmul.f32 0.5, %v588_v41 }
 0x83b   :  { %v662_v44 = vmul.f32 %v1465_v42, %v659_v39  ;;  %vm668_vm3 = vweird.f32 %v1465_v42 }
 0x83c   :  { %v592_v45 = vmul.f32 %v590_v43, %v573_v28  ;;  %vm669_vm5 = vmor %vm667_vm4, %vm668_vm3 }
 0x83d   :  { %v663_v46 = vmul.f32 %v1465_v42, %v662_v44 }
 0x83e   :  { %1357 = vmatmul.msk.f32.gmra.mxu2 %vm605_vm14, %v592_v45 }
 0x83f   :  { %v664_v47 = vmul.f32 0.5, %v663_v46 }
 0x841   :  { %v665_v48 = vsub.f32 1.5, %v664_v47 }
 0x843   :  { %v666_v49 = vmul.f32 %v1465_v42, %v665_v48 }
 0x845   :  { %v670_v53 = vsel %vm669_vm5, %v1465_v42, %v666_v49 }
 0x846   :  { %v681_v54 = vmul.f32 %v670_v53, %v647_v22 }
 0x848   :  { %v686_v56 = vmul.f32 %v1424_v51, %v681_v54 }
 0x84a   :  { %v1841_v57 = vadd.f32 %v1425_v55, %v686_v56 }
 0x84c   :  { %1363 = vmatmul.msk.f32.vlgmr.msra.gmra.mxu1 %vm64_vm0, %v1841_v57 }
 0x8c1   :  { %v632_v58 = vpop.f32.mrf.mxu2 }
 0x8c2   :  { %v633_v59 = vadd.f32 %v1811_v2, %v632_v58 }
 0x8c4   :  { %v636_v52 = vadd.f32 %v633_v59, %v537_v19 }
 0x8c6   :  { %v642_v60 = vsel %vm64_vm0, %v636_v52, 0.0 }
 0x8c7   :  { %643 = vadd.xlane.f32.xlu1 %v642_v60 }
 0x8c9   :  { %v726_v62 = vpop.f32.mrf.mxu1 }
 0x8ca   :  { %v1850_v0 = vadd.f32 %v1426_v61, %v726_v62 }
 0x8cc   :  { %733 = vrot.lane.b32.xlu2 %v1850_v0, %s1524_s19 }
 0x926   :  { %v734_v1 = vpop.permute.xlu2 %733 }
 0x927   :  { %1365 = vmatpush.xpose.msk.msrb.mxu3 %vm170_vm8, %v734_v1 }
 0x92a   :  { %1366 = vmatmul.msk.f32.vlgmr.msrb.gmra.mxu3 %vm170_vm8, %v1850_v0 }
 0x93a   :  { %v644_v2 = vpop.xlane.xlu1 %643 }
 0x93b   :  { %v646_v3 = vmul.f32 %v644_v2, %v1633_v10 }
 0x93d   :  { %v648_v4 = vsub.f32 %v636_v52, %v646_v3 }
 0x93f   :  { %v650_v5 = vmul.f32 %v648_v4, %v648_v4 }
 0x941   :  { %v654_v6 = vsel %vm64_vm0, %v650_v5, 0.0 }
 0x942   :  { %655 = vadd.xlane.f32.xlu1 %v654_v6 }
 0x95b   :  { %799 = vrot.lane.b32.xlu1 %v1850_v0, %s1525_s1 }
 0x963   :  { %770 = vrot.lane.b32.xlu1 %v1850_v0, %s1526_s2 }
 0x9ad   :  { %v756_v7 = vpop.f32.mrf.mxu3 }
 0x9ae   :  { %v757_v8 = vadd.f32 %v756_v7, %v1680_v63 }
 0x9b0   :  { %v759_v9 = vsel %vm195_vm9, %v757_v8, -inf }
 0x9b1   :  { %760 = vmax.xlane.f32.xlu0 %v759_v9 }
 0x9b5   :  { %v656_v11 = vpop.xlane.xlu1 %655 }
 0x9b6   :  { %v658_v12 = vmul.f32 %v656_v11, %v1633_v10 }
 0x9b8   :  { %v660_v13 = vadd.f32 1e-12, %v658_v12 }
 0x9ba   :  { %1466 = vrsqrt.f32 %v660_v13  ;;  %vm677_vm7 = vweird.f32 %v660_v13 }
 0x9c0   :  { %v1467_v50 = vpop.eup %1466 }
 0x9c1   :  { %v672_v14 = vmul.f32 %v1467_v50, %v660_v13  ;;  %vm678_vm6 = vweird.f32 %v1467_v50 }
 0x9c2   :  { %vm679_vm11 = vmor %vm677_vm7, %vm678_vm6  ;;  %vm1291_vm6 = vcmask 122880  }
 0x9c3   :  { %v673_v15 = vmul.f32 %v1467_v50, %v672_v14 }
 0x9c5   :  { %v674_v16 = vmul.f32 0.5, %v673_v15  ;;  %797 = vrot.lane.b32.xlu0 %v1850_v0, %s1523_s3  ;;  %v1380_v15 = vld [vmem:[%s2031_s6 + $0x38] sm:$0xff] }
 0x9c7   :  { %v675_v17 = vsub.f32 1.5, %v674_v16  ;;  %v1379_v16 = vld [vmem:[%s2031_s6 + $0x30] sm:$0xff] }
 0x9c9   :  { %v676_v18 = vmul.f32 %v1467_v50, %v675_v17  ;;  %v1378_v17 = vld [vmem:[%s2031_s6 + $0x28] sm:$0xff] }
 0x9cb   :  { %v680_v19 = vsel %vm679_vm11, %v1467_v50, %v676_v18  ;;  %v1377_v18 = vld [vmem:[%s2031_s6 + $0x20] sm:$0xff] }
 0x9cc   :  { %v682_v20 = vmul.f32 %v680_v19, %v648_v4 }
 0x9cd   :  { %v800_v21 = vpop.permute.xlu1 %799 }
 0x9ce   :  { %1368 = vmatpush.xpose.msk.msrb.mxu1 %vm170_vm8, %v800_v21  ;;  %v687_v22 = vmul.f32 %v1424_v51, %v682_v20 }
 0x9d0   :  { %v1869_v23 = vadd.f32 %v1425_v55, %v687_v22 }
 0x9d2   :  { %1364 = vmatmul.msk.f32.gmra.mxu1 %vm64_vm0, %v1869_v23 }
 0x9d5   :  { %v771_v24 = vpop.permute.xlu1 %770 }
 0x9d6   :  { %791 = vmatpush.msrb.mxu0 %v771_v24 }
 0xa24   :  { %v761_v26 = vpop.xlane.xlu0 %760 }
 0xa25   :  { %v762_v27 = vsub.f32 %v757_v8, %v761_v26 }
 0xa27   :  { %v763_v28 = vmul.f32 1.442695, %v762_v27  ;;  %v1427_v27 = vld [vmem:[%s2032_s7 + $0x1] ss:$0 sm:$0xff]  ;;  %s1329_s7 = sshll.u32 %s2043_s18, 4  ;;  %s1330_s7 = int_to_ptr.hbm [resolvable:$true] %s1329_s7 }
 0xa29   :  { %1468 = vpow2.f32 %v763_v28 }
 0xa2f   :  { %v1469_v29 = vpop.eup %1468 }
 0xa30   :  { %v765_v30 = vsel %vm195_vm9, %v1469_v29, 0.0 }
 0xa31   :  { %766 = vadd.xlane.f32.xlu0 %v765_v30 }
 0xa37   :  { %v798_v31 = vpop.permute.xlu0 %797 }
 0xa38   :  { %1369 = vmatmul.msk.f32.vlgmr.msrb.gmra.mxu1 %vm170_vm8, %v798_v31 }
 0xa4f   :  { %v729_v32 = vpop.f32.mrf.mxu1 }
 0xa50   :  { %v730_v33 = vadd.f32 %v1426_v61, %v729_v32 }
 0xa52   :  { %934 = vrot.lane.b32.xlu2 %v730_v33, %s1525_s1 }
 0xa5a   :  { %932 = vrot.lane.b32.xlu2 %v730_v33, %s1523_s3 }
 0xa62   :  { %868 = vrot.lane.b32.xlu2 %v730_v33, %s1524_s19 }
 0xaa4   :  { %v767_v34 = vpop.xlane.xlu0 %766 }
 0xaa5   :  { %1470 = vrcp.f32 %v767_v34 }
 0xaab   :  { %v1471_v35 = vpop.eup %1470 }
 0xaac   :  { %v769_v36 = vmul.f32 %v1471_v35, %v1469_v29  ;;  %v935_v37 = vpop.permute.xlu2 %934 }
 0xaad   :  { %1374 = vmatpush.xpose.msk.msra.mxu1 %vm170_vm8, %v935_v37 }
 0xaae   :  { %1367 = vmatmul.msk.f32.vlgmr.msrb.gmra.mxu0 %vm195_vm9, %v769_v36 }
 0xab4   :  { %v933_v38 = vpop.permute.xlu2 %932 }
 0xab5   :  { %v822_v39 = vpop.f32.mrf.mxu1  ;;  %1375 = vmatmul.msk.f32.vlgmr.msra.gmra.mxu1 %vm170_vm8, %v933_v38 }
 0xab6   :  { %v823_v40 = vadd.f32 %v822_v39, %v1680_v63 }
 0xab8   :  { %v825_v41 = vsel %vm195_vm9, %v823_v40, -inf }
 0xab9   :  { %826 = vmax.xlane.f32.xlu1 %v825_v41 }
 0xabc   :  { %v869_v42 = vpop.permute.xlu2 %868 }
 0xabd   :  { %1371 = vmatpush.xpose.msk.msra.mxu0 %vm170_vm8, %v869_v42 }
 0xac0   :  { %1372 = vmatmul.msk.f32.vlgmr.msra.gmra.mxu0 %vm170_vm8, %v730_v33 }
 0xac1   :  { %1032 = vmatpush.msrb.mxu0 %v1380_v15  ;;  %v1398_v15 = vld [vmem:[%s2037_s12 + $0x68] sm:$0xff] }
 0xac3   :  { %1033 = vmatpush.msrb.mxu0 %v1379_v16  ;;  %v1397_v16 = vld [vmem:[%s2037_s12 + $0x60] sm:$0xff] }
 0xac5   :  { %1034 = vmatpush.msrb.mxu0 %v1378_v17  ;;  %v1396_v17 = vld [vmem:[%s2037_s12 + $0x58] sm:$0xff] }
 0xac7   :  { %1035 = vmatpush.msrb.mxu0 %v1377_v18  ;;  %v1395_v18 = vld [vmem:[%s2037_s12 + $0x50] sm:$0xff] }
 0xb2b   :  { %v793_v43 = vpop.f32.mrf.mxu0 }
 0xb2c   :  { %796 = vst.msk [vmem:[#allocation2] sm:$0xff] %vm170_vm8, %v793_v43  ;;  %v827_v44 = vpop.xlane.xlu1 %826 }
 0xb2d   :  { %v828_v45 = vsub.f32 %v823_v40, %v827_v44 }
 0xb2f   :  { %v829_v46 = vmul.f32 1.442695, %v828_v45  ;;  %v1388_v45 = vld [vmem:[%s2035_s10 + $0x30] sm:$0xff] }
 0xb31   :  { %1472 = vpow2.f32 %v829_v46  ;;  %v1387_v46 = vld [vmem:[%s2035_s10 + $0x28] sm:$0xff] }
 0xb32   :  { %v957_v47 = vpop.f32.mrf.mxu1 }
 0xb33   :  { %v958_v48 = vadd.f32 %v957_v47, %v1703_v25  ;;  %v1386_v47 = vld [vmem:[%s2035_s10 + $0x20] sm:$0xff] }
 0xb35   :  { %v960_v63 = vsel %vm195_vm9, %v958_v48, -inf }
 0xb36   :  { %961 = vmax.xlane.f32.xlu2 %v960_v63 }
 0xb37   :  { %v1473_v49 = vpop.eup %1472 }
 0xb38   :  { %v831_v51 = vsel %vm195_vm9, %v1473_v49, 0.0 }
 0xb39   :  { %832 = vadd.xlane.f32.xlu0 %v831_v51 }
 0xb3d   :  { %v891_v53 = vpop.f32.mrf.mxu0 }
 0xb3e   :  { %v892_v54 = vadd.f32 %v891_v53, %v1703_v25 }
 0xb40   :  { %v894_v55 = vsel %vm195_vm9, %v892_v54, -inf }
 0xb41   :  { %895 = vmax.xlane.f32.xlu0 %v894_v55 }
 0xb4e   :  { %836 = vrot.lane.b32.xlu2 %v1850_v0, %s1527_s23 }
 0xb55   :  { %971 = vrot.lane.b32.xlu0 %v730_v33, %s1527_s23 }
 0xba9   :  { %v962_v56 = vpop.xlane.xlu2 %961 }
 0xbaa   :  { %v963_v58 = vsub.f32 %v958_v48, %v962_v56 }
 0xbac   :  { %v964_v59 = vmul.f32 1.442695, %v963_v58  ;;  %v833_v52 = vpop.xlane.xlu0 %832 }
 0xbad   :  { %1474 = vrcp.f32 %v833_v52 }
 0xbae   :  { %1476 = vpow2.f32 %v964_v59  ;;  %v1428_v59 = vld [vmem:[%s2033_s8 + $0x1] ss:$0 sm:$0xff] }
 0xbb1   :  { %v837_v60 = vpop.permute.xlu2 %836 }
 0xbb2   :  { %857 = vmatpush.msra.mxu3 %v837_v60 }
 0xbb3   :  { %v1475_v61 = vpop.eup %1474 }
 0xbb4   :  { %v1477_v62 = vpop.eup %1476  ;;  %v835_v1 = vmul.f32 %v1475_v61, %v1473_v49  ;;  %v896_v25 = vpop.xlane.xlu0 %895  ;;  %v1429_v61 = vld [vmem:[%s2034_s9 + $0x1] ss:$0 sm:$0xff] }
 0xbb5   :  { %v897_v2 = vsub.f32 %v892_v54, %v896_v25  ;;  %v966_v3 = vsel %vm195_vm9, %v1477_v62, 0.0 }
 0xbb6   :  { %967 = vadd.xlane.f32.xlu1 %v966_v3  ;;  %1370 = vmatmul.msk.f32.vlgmr.msra.gmra.mxu3 %vm195_vm9, %v835_v1 }
 0xbb7   :  { %v898_v0 = vmul.f32 1.442695, %v897_v2 }
 0xbb9   :  { %1478 = vpow2.f32 %v898_v0 }
 0xbbf   :  { %v1479_v4 = vpop.eup %1478 }
 0xbc0   :  { %v900_v5 = vsel %vm195_vm9, %v1479_v4, 0.0 }
 0xbc1   :  { %901 = vadd.xlane.f32.xlu1 %v900_v5 }
 0xbc7   :  { %v972_v6 = vpop.permute.xlu0 %971 }
 0xbc8   :  { %992 = vmatpush.msrb.mxu3 %v972_v6 }
 0xbda   :  { %905 = vrot.lane.b32.xlu1 %v730_v33, %s1526_s2 }
 0xc29   :  { %v968_v7 = vpop.xlane.xlu1 %967 }
 0xc2a   :  { %1480 = vrcp.f32 %v968_v7 }
 0xc30   :  { %v1481_v8 = vpop.eup %1480 }
 0xc31   :  { %v970_v9 = vmul.f32 %v1481_v8, %v1477_v62 }
 0xc33   :  { %1376 = vmatmul.msk.f32.vlgmr.msrb.gmra.mxu3 %vm195_vm9, %v970_v9 }
 0xc34   :  { %v902_v12 = vpop.xlane.xlu1 %901 }
 0xc35   :  { %1482 = vrcp.f32 %v902_v12 }
 0xc39   :  { %v859_v11 = vpop.f32.mrf.mxu3 }
 0xc3a   :  { %863 = vrot.lane.b32.xlu0 %v859_v11, %s1528_s24 }
 0xc3b   :  { %v1483_v13 = vpop.eup %1482 }
 0xc3c   :  { %v904_v50 = vmul.f32 %v1483_v13, %v1479_v4 }
 0xc4c   :  { %v906_v14 = vpop.permute.xlu1 %905 }
 0xc4d   :  { %926 = vmatpush.msra.mxu2 %v906_v14  ;;  %v1399_v14 = vld [vmem:[%s2037_s12 + $0x70] sm:$0xff] }
 0xc4e   :  { %1373 = vmatmul.msk.f32.vlgmr.msra.gmra.mxu2 %vm195_vm9, %v904_v50  ;;  %v1400_v50 = vld [vmem:[%s2037_s12 + $0x78] sm:$0xff] }
 0xc4f   :  { %1188 = vmatpush.msrb.mxu1 %v1400_v50  ;;  %v1432_v50 = vld [vmem:[%s2039_s14 + $0x1] ss:$0 sm:$0xff] }
 0xc51   :  { %1189 = vmatpush.msrb.mxu1 %v1399_v14 }
 0xc53   :  { %1190 = vmatpush.msrb.mxu1 %v1398_v15 }
 0xc55   :  { %1191 = vmatpush.msrb.mxu1 %v1397_v16  ;;  %v1433_v16 = vld [vmem:[%s2040_s15 + $0x1] ss:$0 sm:$0xff] }
 0xc57   :  { %1192 = vmatpush.msrb.mxu1 %v1396_v17 }
 0xc59   :  { %1193 = vmatpush.msrb.mxu1 %v1395_v18 }
 0xcac   :  { %v864_v19 = vpop.permute.xlu0 %863 }
 0xcad   :  { %866 = vst.msk [vmem:[#allocation2] sm:$0xff] %vm303_vm10, %v864_v19  ;;  %v1394_v19 = vld [vmem:[%s2037_s12 + $0x48] sm:$0xff] }
 0xcae   :  { %1194 = vmatpush.msrb.mxu1 %v1394_v19 }
 0xcb4   :  { %v1002_v20 = vld [vmem:[#allocation2] sm:$0xff] }
 0xcb5   :  { %1382 = vmatmul.msk.f32.vlgmr.msrb.gmra.mxu0 %vm64_vm0, %v1002_v20  ;;  %v1393_v20 = vld [vmem:[%s2037_s12 + $0x40] sm:$0xff] }
 0xcb6   :  { %v994_v21 = vpop.f32.mrf.mxu3  ;;  %1195 = vmatpush.msrb.mxu1 %v1393_v20 }
 0xcb7   :  { %998 = vrot.lane.b32.xlu2 %v994_v21, %s1528_s24  ;;  %v1430_v21 = vld [vmem:[%s2036_s11 + $0x1] ss:$0 sm:$0xff] }
 0xcd1   :  { %v928_v22 = vpop.f32.mrf.mxu2 }
 0xcd2   :  { %931 = vst.msk [vmem:[#allocation2 + $0x8] sm:$0xff] %vm170_vm8, %v928_v22 }
 0xd11   :  { %v999_v24 = vpop.permute.xlu2 %998 }
 0xd12   :  { %1001 = vst.msk [vmem:[#allocation2 + $0x8] sm:$0xff] %vm303_vm10, %v999_v24 }
 0xd19   :  { %v1003_v26 = vld [vmem:[#allocation2 + $0x8] sm:$0xff] }
 0xd1a   :  { %1383 = vmatmul.msk.f32.gmra.mxu0 %vm64_vm0, %v1003_v26 }
 0xd32   :  { %v1037_v28 = vpop.f32.mrf.mxu0 }
 0xd33   :  { %v1038_v29 = vadd.f32 %v1427_v27, %v1037_v28 }
 0xd35   :  { %v1043_v30 = vadd.f32 %v1038_v29, %v1841_v57 }
 0xd37   :  { %v1049_v31 = vsel %vm64_vm0, %v1043_v30, 0.0 }
 0xd38   :  { %1050 = vadd.xlane.f32.xlu0 %v1049_v31 }
 0xd97   :  { %v1040_v32 = vpop.f32.mrf.mxu0 }
 0xd98   :  { %v1041_v33 = vadd.f32 %v1427_v27, %v1040_v32 }
 0xd9a   :  { %v1044_v34 = vadd.f32 %v1041_v33, %v1869_v23  ;;  %v1389_v23 = vld [vmem:[%s2035_s10 + $0x38] sm:$0xff] }
 0xd9b   :  { %1131 = vmatpush.msrb.mxu2 %v1389_v23  ;;  %v1431_v23 = vld [vmem:[%s2038_s13 + $0x1] ss:$0 sm:$0xff] }
 0xd9c   :  { %v1052_v35 = vsel %vm64_vm0, %v1044_v34, 0.0 }
 0xd9d   :  { %1053 = vadd.xlane.f32.xlu2 %v1052_v35  ;;  %1132 = vmatpush.msrb.mxu2 %v1388_v45 }
 0xd9f   :  { %1133 = vmatpush.msrb.mxu2 %v1387_v46 }
 0xda1   :  { %1134 = vmatpush.msrb.mxu2 %v1386_v47 }
 0xdab   :  { %v1051_v36 = vpop.xlane.xlu0 %1050 }
 0xdac   :  { %v1055_v37 = vmul.f32 %v1051_v36, %v1633_v10 }
 0xdae   :  { %v1057_v38 = vsub.f32 %v1043_v30, %v1055_v37 }
 0xdb0   :  { %v1059_v39 = vmul.f32 %v1057_v38, %v1057_v38 }
 0xdb2   :  { %v1061_v40 = vsel %vm64_vm0, %v1059_v39, 0.0 }
 0xdb3   :  { %1062 = vadd.xlane.f32.xlu1 %v1061_v40 }
 0xe10   :  { %v1054_v41 = vpop.xlane.xlu2 %1053 }
 0xe11   :  { %v1056_v57 = vmul.f32 %v1054_v41, %v1633_v10 }
 0xe13   :  { %v1058_v42 = vsub.f32 %v1044_v34, %v1056_v57 }
 0xe15   :  { %v1060_v43 = vmul.f32 %v1058_v42, %v1058_v42 }
 0xe17   :  { %v1064_v44 = vsel %vm64_vm0, %v1060_v43, 0.0 }
 0xe18   :  { %1065 = vadd.xlane.f32.xlu2 %v1064_v44 }
 0xe26   :  { %v1063_v48 = vpop.xlane.xlu1 %1062 }
 0xe27   :  { %v1067_v63 = vmul.f32 %v1063_v48, %v1633_v10 }
 0xe29   :  { %v1069_v49 = vadd.f32 1e-12, %v1067_v63 }
 0xe2b   :  { %1484 = vrsqrt.f32 %v1069_v49  ;;  %vm1077_vm9 = vweird.f32 %v1069_v49 }
 0xe31   :  { %v1485_v51 = vpop.eup %1484 }
 0xe32   :  { %v1072_v53 = vmul.f32 %v1485_v51, %v1069_v49  ;;  %vm1078_vm8 = vweird.f32 %v1485_v51 }
 0xe33   :  { %vm1079_vm10 = vmor %vm1077_vm9, %vm1078_vm8 }
 0xe34   :  { %v1073_v54 = vmul.f32 %v1485_v51, %v1072_v53 }
 0xe36   :  { %v1074_v55 = vmul.f32 0.5, %v1073_v54 }
 0xe38   :  { %v1075_v56 = vsub.f32 1.5, %v1074_v55 }
 0xe3a   :  { %v1076_v58 = vmul.f32 %v1485_v51, %v1075_v56 }
 0xe3c   :  { %v1080_v52 = vsel %vm1079_vm10, %v1485_v51, %v1076_v58 }
 0xe3d   :  { %v1091_v60 = vmul.f32 %v1080_v52, %v1057_v38 }
 0xe3f   :  { %v1096_v62 = vmul.f32 %v1428_v59, %v1091_v60 }
 0xe41   :  { %v1949_v1 = vadd.f32 %v1429_v61, %v1096_v62 }
 0xe43   :  { %1391 = vmatmul.msk.f32.vlgmr.msrb.gmra.mxu2 %vm64_vm0, %v1949_v1 }
 0xe8b   :  { %v1066_v25 = vpop.xlane.xlu2 %1065 }
 0xe8c   :  { %v1068_v2 = vmul.f32 %v1066_v25, %v1633_v10  ;;  %v1266_v25 = vld [vmem:[%s2041_s16 + $0x18] sm:$0xff] }
 0xe8d   :  { %1283 = vmatpush.msra.mxu3 %v1266_v25 }
 0xe8e   :  { %v1070_v3 = vadd.f32 1e-12, %v1068_v2  ;;  %v1265_v2 = vld [vmem:[%s2041_s16 + $0x10] sm:$0xff] }
 0xe8f   :  { %1284 = vmatpush.msra.mxu3 %v1265_v2 }
 0xe90   :  { %1486 = vrsqrt.f32 %v1070_v3  ;;  %vm1087_vm13 = vweird.f32 %v1070_v3 }
 0xe96   :  { %v1487_v0 = vpop.eup %1486 }
 0xe97   :  { %v1082_v4 = vmul.f32 %v1487_v0, %v1070_v3  ;;  %vm1088_vm12 = vweird.f32 %v1487_v0  ;;  %v1264_v3 = vld [vmem:[%s2041_s16 + $0x8] sm:$0xff] }
 0xe98   :  { %vm1089_vm15 = vmor %vm1087_vm13, %vm1088_vm12  ;;  %1285 = vmatpush.msra.mxu3 %v1264_v3 }
 0xe99   :  { %v1083_v5 = vmul.f32 %v1487_v0, %v1082_v4 }
 0xe9b   :  { %v1084_v6 = vmul.f32 0.5, %v1083_v5 }
 0xe9d   :  { %v1085_v7 = vsub.f32 1.5, %v1084_v6 }
 0xe9f   :  { %v1086_v8 = vmul.f32 %v1487_v0, %v1085_v7 }
 0xea1   :  { %v1090_v9 = vsel %vm1089_vm15, %v1487_v0, %v1086_v8  ;;  %v1263_v0 = vld [vmem:[%s2041_s16] sm:$0xff] }
 0xea2   :  { %v1092_v11 = vmul.f32 %v1090_v9, %v1058_v42  ;;  %1286 = vmatpush.msra.mxu3 %v1263_v0 }
 0xea4   :  { %v1097_v12 = vmul.f32 %v1428_v59, %v1092_v11  ;;  %1313 = vmatpush.msrb.mxu3 %v1266_v25 }
 0xea6   :  { %v1102_v13 = vadd.f32 %v1429_v61, %v1097_v12  ;;  %1314 = vmatpush.msrb.mxu3 %v1265_v2 }
 0xea8   :  { %1392 = vmatmul.msk.f32.gmra.mxu2 %vm64_vm0, %v1102_v13  ;;  %1315 = vmatpush.msrb.mxu3 %v1264_v3 }
 0xeaa   :  { %1316 = vmatpush.msrb.mxu3 %v1263_v0 }
 0xec6   :  { %v1136_v22 = vpop.f32.mrf.mxu2 }
 0xec7   :  { %v1137_v24 = vadd.f32 %v1430_v21, %v1136_v22 }
 0xec9   :  { %v1142_v26 = vmul.f32 %v1137_v24, %v1137_v24 }
 0xecb   :  { %v1144_v27 = vmul.f32 %v1142_v26, %v1137_v24 }
 0xecd   :  { %v1146_v28 = vmul.f32 0.044715, %v1144_v27 }
 0xecf   :  { %v1148_v29 = vadd.f32 %v1146_v28, %v1137_v24 }
 0xed1   :  { %v1150_v30 = vmul.f32 0.7978846, %v1148_v29 }
 0xed3   :  { %1488 = vtanh.f32 %v1150_v30 }
 0xed9   :  { %v1489_v31 = vpop.eup %1488 }
 0xeda   :  { %v1154_v32 = vadd.f32 1.0, %v1489_v31 }
 0xedc   :  { %v1156_v33 = vmul.f32 0.5, %v1154_v32 }
 0xede   :  { %v1158_v34 = vmul.f32 %v1156_v33, %v1137_v24 }
 0xee0   :  { %1402 = vmatmul.msk.f32.vlgmr.msrb.gmra.mxu1 %vm605_vm14, %v1158_v34 }
 0xf2b   :  { %v1139_v35 = vpop.f32.mrf.mxu2 }
 0xf2c   :  { %v1140_v36 = vadd.f32 %v1430_v21, %v1139_v35 }
 0xf2e   :  { %v1143_v37 = vmul.f32 %v1140_v36, %v1140_v36 }
 0xf30   :  { %v1145_v38 = vmul.f32 %v1143_v37, %v1140_v36 }
 0xf32   :  { %v1147_v39 = vmul.f32 0.044715, %v1145_v38 }
 0xf34   :  { %v1149_v40 = vadd.f32 %v1147_v39, %v1140_v36 }
 0xf36   :  { %v1151_v41 = vmul.f32 0.7978846, %v1149_v40 }
 0xf38   :  { %1490 = vtanh.f32 %v1151_v41 }
 0xf3e   :  { %v1491_v57 = vpop.eup %1490 }
 0xf3f   :  { %v1155_v42 = vadd.f32 1.0, %v1491_v57 }
 0xf41   :  { %v1157_v43 = vmul.f32 0.5, %v1155_v42 }
 0xf43   :  { %v1159_v44 = vmul.f32 %v1157_v43, %v1140_v36  ;;  %v1297_v36 = vld [vmem:[%s2042_s17] sm:$0x1] }
 0xf45   :  { %1403 = vmatmul.msk.f32.gmra.mxu1 %vm605_vm14, %v1159_v44 }
 0xf5d   :  { %v1197_v45 = vpop.f32.mrf.mxu1 }
 0xf5e   :  { %v1198_v46 = vadd.f32 %v1431_v23, %v1197_v45 }
 0xf60   :  { %v1203_v47 = vadd.f32 %v1198_v46, %v1949_v1 }
 0xf62   :  { %v1209_v48 = vsel %vm64_vm0, %v1203_v47, 0.0 }
 0xf63   :  { %1210 = vadd.xlane.f32.xlu0 %v1209_v48 }
 0xfc2   :  { %v1200_v63 = vpop.f32.mrf.mxu1 }
 0xfc3   :  { %v1201_v49 = vadd.f32 %v1431_v23, %v1200_v63 }
 0xfc5   :  { %v1204_v51 = vadd.f32 %v1201_v49, %v1102_v13 }
 0xfc7   :  { %v1212_v53 = vsel %vm64_vm0, %v1204_v51, 0.0 }
 0xfc8   :  { %1213 = vadd.xlane.f32.xlu1 %v1212_v53 }
 0xfd6   :  { %v1211_v54 = vpop.xlane.xlu0 %1210 }
 0xfd7   :  { %v1215_v55 = vmul.f32 %v1211_v54, %v1633_v10 }
 0xfd9   :  { %v1217_v56 = vsub.f32 %v1203_v47, %v1215_v55 }
 0xfdb   :  { %v1219_v58 = vmul.f32 %v1217_v56, %v1217_v56 }
 0xfdd   :  { %v1221_v59 = vsel %vm64_vm0, %v1219_v58, 0.0 }
 0xfde   :  { %1222 = vadd.xlane.f32.xlu2 %v1221_v59 }
0x103b   :  { %v1214_v52 = vpop.xlane.xlu1 %1213 }
0x103c   :  { %v1216_v60 = vmul.f32 %v1214_v52, %v1633_v10 }
0x103e   :  { %v1218_v61 = vsub.f32 %v1204_v51, %v1216_v60 }
0x1040   :  { %v1220_v62 = vmul.f32 %v1218_v61, %v1218_v61 }
0x1042   :  { %v1224_v1 = vsel %vm64_vm0, %v1220_v62, 0.0 }
0x1043   :  { %1225 = vadd.xlane.f32.xlu0 %v1224_v1 }
0x1051   :  { %v1223_v4 = vpop.xlane.xlu2 %1222 }
0x1052   :  { %v1227_v5 = vmul.f32 %v1223_v4, %v1633_v10 }
0x1054   :  { %v1229_v6 = vadd.f32 1e-12, %v1227_v5 }
0x1056   :  { %1492 = vrsqrt.f32 %v1229_v6  ;;  %vm1237_vm1 = vweird.f32 %v1229_v6 }
0x105c   :  { %v1493_v7 = vpop.eup %1492 }
0x105d   :  { %v1232_v8 = vmul.f32 %v1493_v7, %v1229_v6  ;;  %vm1238_vm14 = vweird.f32 %v1493_v7 }
0x105e   :  { %vm1239_vm2 = vmor %vm1237_vm1, %vm1238_vm14 }
0x105f   :  { %v1233_v9 = vmul.f32 %v1493_v7, %v1232_v8 }
0x1061   :  { %v1234_v11 = vmul.f32 0.5, %v1233_v9 }
0x1063   :  { %v1235_v12 = vsub.f32 1.5, %v1234_v11 }
0x1065   :  { %v1236_v13 = vmul.f32 %v1493_v7, %v1235_v12 }
0x1067   :  { %v1240_v14 = vsel %vm1239_vm2, %v1493_v7, %v1236_v13 }
0x1068   :  { %v1251_v15 = vmul.f32 %v1240_v14, %v1217_v56 }
0x106a   :  { %v1256_v17 = vmul.f32 %v1432_v50, %v1251_v15 }
0x106c   :  { %v1261_v18 = vadd.f32 %v1433_v16, %v1256_v17 }
0x106e   :  { %1406 = vmatmul.msk.f32.vlgmr.msra.gmra.mxu3 %vm64_vm0, %v1261_v18 }
0x10b6   :  { %v1226_v19 = vpop.xlane.xlu0 %1225 }
0x10b7   :  { %v1228_v20 = vmul.f32 %v1226_v19, %v1633_v10  ;;  %v1267_v10 = vld [vmem:[%s2042_s17] sm:$0x1] }
0x10b9   :  { %v1230_v21 = vadd.f32 1e-12, %v1228_v20 }
0x10bb   :  { %1494 = vrsqrt.f32 %v1230_v21  ;;  %vm1247_vm4 = vweird.f32 %v1230_v21 }
0x10c1   :  { %v1495_v22 = vpop.eup %1494 }
0x10c2   :  { %v1242_v24 = vmul.f32 %v1495_v22, %v1230_v21  ;;  %vm1248_vm3 = vweird.f32 %v1495_v22 }
0x10c3   :  { %vm1249_vm5 = vmor %vm1247_vm4, %vm1248_vm3 }
0x10c4   :  { %v1243_v26 = vmul.f32 %v1495_v22, %v1242_v24 }
0x10c6   :  { %v1244_v27 = vmul.f32 0.5, %v1243_v26 }
0x10c8   :  { %v1245_v28 = vsub.f32 1.5, %v1244_v27 }
0x10ca   :  { %v1246_v29 = vmul.f32 %v1495_v22, %v1245_v28 }
0x10cc   :  { %v1250_v30 = vsel %vm1249_vm5, %v1495_v22, %v1246_v29 }
0x10cd   :  { %v1252_v31 = vmul.f32 %v1250_v30, %v1218_v61 }
0x10cf   :  { %v1257_v32 = vmul.f32 %v1432_v50, %v1252_v31 }
0x10d1   :  { %v1262_v33 = vadd.f32 %v1433_v16, %v1257_v32 }
0x10d3   :  { %1407 = vmatmul.msk.f32.vlgmr.msrb.gmra.mxu3 %vm64_vm0, %v1262_v33 }
0x10f1   :  { %v1288_v34 = vpop.f32.mrf.mxu3 }
0x10f2   :  { %v1289_v35 = vadd.f32 %v1288_v34, %v1267_v10 }
0x10f4   :  { %1292 = vst.msk [vmem:[#allocation3] sm:$0x1] %vm1291_vm6, %v1289_v35 }
0x1156   :  { %v1318_v37 = vpop.f32.mrf.mxu3 }
0x1157   :  { %v1319_v38 = vadd.f32 %v1318_v37, %v1297_v36 }
0x1159   :  { %1321 = vst.msk [vmem:[#allocation3 + $0x1] sm:$0x1] %vm1291_vm6, %v1319_v38 }
0x115a   :  { %1332 = dma.vmem_to_hbm [thread:$0]  %s1328_s0, 32, %s1330_s7, [#allocation4]  }
0x115b   :  { %1520 = dma.done.wait [#allocation4], 32  }
0x115c   :  { %1521 = vsyncadd [#allocation4], 4294967264 }
0x115d   :  { %1337 = vsyncpa [#allocation4], 1 }

</bundles_post_ra>
